<compile_context>
chip_gen: v6e
topology: v6e:2x2x1
jax: 0.10.0
libtpu: 0.0.40
codegen_flags: <defaults>
</compile_context>

<pallas_src>
import jax
import jax.numpy as jnp
from jax.experimental import pallas as pl
from jax.experimental.pallas import tpu as pltpu

# ---- model dims (small, consistent with the module's forward) ----
B = 2
S_IN = 16
S_CTX = 8
SEQ = S_CTX + S_IN
INPUT_DIM = 64
CONTEXT_DIM = 64
DIM = 256
NUM_HEADS = 2
HEAD_DIM = DIM // NUM_HEADS          # 128 -> lane-aligned head dim
PARTIAL_ROTARY_FACTOR = 1.0          # module default
ROTARY_DIM = int(HEAD_DIM * PARTIAL_ROTARY_FACTOR)
BASE = 10000
SCALE = HEAD_DIM ** (-0.5)
RMS_EPS = 1e-6
# Lane-dense padded width for the fused output slab (>= max(INPUT_DIM, CONTEXT_DIM)).
OUT_W = max(128, ((max(INPUT_DIM, CONTEXT_DIM) + 127) // 128) * 128)


# -------------------- fused Pallas kernel --------------------

def _rotate_half(x, half):
    # GPT-NeoX rotate_half on the last (lane) axis: [x1, x2] -> [-x2, x1].
    # Static lane slices + concat (XLU shuffle); avoids pltpu.roll axis restrictions
    # and runs under TPU interpret mode as well.
    return jnp.concatenate([-x[:, half:], x[:, :half]], axis=1)


def _mmdit_fused_kernel(
    inp_ref, ctx_ref,
    w_qkv_in_ref, b_qkv_in_ref,
    w_qkv_ctx_ref, b_qkv_ctx_ref,
    g_ref,
    w_out_ctx_ref, b_out_ctx_ref,
    w_out_in_ref, b_out_in_ref,
    rope_ref,
    out_ref,
):
    # One batch element per grid step; everything below lives in VMEM / vregs.
    s_in = inp_ref.shape[0]
    s_ctx = ctx_ref.shape[0]

    # ---- QKV projections (MXU) ----
    qkv_in = (
        jnp.dot(inp_ref[...], w_qkv_in_ref[...], preferred_element_type=jnp.float32)
        + b_qkv_in_ref[...]
    )                                                           # (S_in, 3*DIM)
    qkv_ctx = (
        jnp.dot(ctx_ref[...], w_qkv_ctx_ref[...], preferred_element_type=jnp.float32)
        + b_qkv_ctx_ref[...]
    )                                                           # (S_ctx, 3*DIM)

    iq, ik, iv = qkv_in[:, :DIM], qkv_in[:, DIM:2 * DIM], qkv_in[:, 2 * DIM:]
    cq, ck, cv = qkv_ctx[:, :DIM], qkv_ctx[:, DIM:2 * DIM], qkv_ctx[:, 2 * DIM:]

    # ---- QKNorm: RMSNorm over the full inner dim, learnable per-stream scale ----
    def rms(x, g_row):
        ms = jnp.mean(x * x, axis=-1, keepdims=True)
        return x * jax.lax.rsqrt(ms + RMS_EPS) * g_row

    iq = rms(iq, g_ref[0:1, :])
    ik = rms(ik, g_ref[1:2, :])
    cq = rms(cq, g_ref[2:3, :])
    ck = rms(ck, g_ref[3:4, :])

    # ---- concat [context, input] along the sequence axis ----
    q = jnp.concatenate([cq, iq], axis=0)                       # (N, DIM)
    k = jnp.concatenate([ck, ik], axis=0)
    v = jnp.concatenate([cv, iv], axis=0)

    cos = rope_ref[:, :HEAD_DIM]                                # (N, HEAD_DIM)
    sin = rope_ref[:, HEAD_DIM:]                                # (N, HEAD_DIM)
    half = ROTARY_DIM // 2

    # ---- per-head RoPE + scaled-dot-product attention ----
    # Heads are lane-aligned column slices of the (N, DIM) tensors (HEAD_DIM=128),
    # so no reshape/transpose copies are needed.
    dn = (((1,), (1,)), ((), ()))   # contract last dims of both -> no k.T materialization
    head_out = []
    for h in range(NUM_HEADS):
        lo, hi = h * HEAD_DIM, (h + 1) * HEAD_DIM
        qh = q[:, lo:hi] * SCALE    # fold the score scale into q (scalar, commutes with RoPE)
        kh = k[:, lo:hi]
        vh = v[:, lo:hi]
        qh = qh * cos + _rotate_half(qh, half) * sin
        kh = kh * cos + _rotate_half(kh, half) * sin
        s = jax.lax.dot_general(qh, kh, dn, preferred_element_type=jnp.float32)  # (N, N)
        s = s - jnp.max(s, axis=-1, keepdims=True)
        p = jnp.exp(s)
        p = p / jnp.sum(p, axis=-1, keepdims=True)
        head_out.append(jnp.dot(p, vh, preferred_element_type=jnp.float32))      # (N, HEAD_DIM)
    attn = jnp.concatenate(head_out, axis=1)                    # (N, DIM) == 'b n (h d)'

    # ---- output projections, written as one lane-dense (N, OUT_W=128) slab ----
    # Context rows first (positions [:S_ctx]), then input rows, matching the concat order.
    out_ref[:s_ctx, :] = (
        jnp.dot(attn[:s_ctx, :], w_out_ctx_ref[...], preferred_element_type=jnp.float32)
        + b_out_ctx_ref[...]
    )
    out_ref[s_ctx:, :] = (
        jnp.dot(attn[s_ctx:, :], w_out_in_ref[...], preferred_element_type=jnp.float32)
        + b_out_in_ref[...]
    )
    # TODO(synk): at production DiT sizes, cast MXU inputs to bf16 (f32 accumulate) and
    #             switch to a flash-style k-tiled loop before the full NxN score matrix
    #             outgrows v7x's 64 MiB VMEM.


# -------------------- wrapper --------------------

def mmdit_attention_forward(params, inp, ctx, rope_tab):
    b, s_in, in_dim = inp.shape
    _, s_ctx, ctx_dim = ctx.shape
    n = s_ctx + s_in

    out = pl.pallas_call(
        _mmdit_fused_kernel,
        out_shape=jax.ShapeDtypeStruct((b, n, OUT_W), jnp.float32),
        grid=(b,),
        in_specs=[
            pl.BlockSpec((None, s_in, in_dim), lambda i: (i, 0, 0)),      # input
            pl.BlockSpec((None, s_ctx, ctx_dim), lambda i: (i, 0, 0)),    # context
            pl.BlockSpec((in_dim, 3 * DIM), lambda i: (0, 0)),            # w_qkv_in
            pl.BlockSpec((1, 3 * DIM), lambda i: (0, 0)),                 # b_qkv_in
            pl.BlockSpec((ctx_dim, 3 * DIM), lambda i: (0, 0)),           # w_qkv_ctx
            pl.BlockSpec((1, 3 * DIM), lambda i: (0, 0)),                 # b_qkv_ctx
            pl.BlockSpec((4, DIM), lambda i: (0, 0)),                     # QKNorm scales
            pl.BlockSpec((DIM, OUT_W), lambda i: (0, 0)),                 # w_out_ctx (padded)
            pl.BlockSpec((1, OUT_W), lambda i: (0, 0)),                   # b_out_ctx (padded)
            pl.BlockSpec((DIM, OUT_W), lambda i: (0, 0)),                 # w_out_in (padded)
            pl.BlockSpec((1, OUT_W), lambda i: (0, 0)),                   # b_out_in (padded)
            pl.BlockSpec((n, 2 * HEAD_DIM), lambda i: (0, 0)),            # packed cos|sin table
        ],
        out_specs=pl.BlockSpec((None, n, OUT_W), lambda i: (i, 0, 0)),
        compiler_params=pltpu.CompilerParams(
            dimension_semantics=("parallel",),   # batch axis -> sharded across v7x's 2 TCs
        ),
    )(
        inp, ctx,
        params["w_qkv_in"], params["b_qkv_in"],
        params["w_qkv_ctx"], params["b_qkv_ctx"],
        params["g_qk"],
        params["w_out_ctx_pad"], params["b_out_ctx_pad"],
        params["w_out_in_pad"], params["b_out_in_pad"],
        rope_tab,
    )
    # Slice the lane-dense slab back into the two streams / their true widths.
    ctx_out = out[:, :s_ctx, :ctx_dim]
    inp_out = out[:, s_ctx:, :in_dim]
    return inp_out, ctx_out


# -------------------- parameter init & RoPE tables --------------------

def init_params(key):
    keys = jax.random.split(key, 4)

    def lin(k, din, dout):
        bound = float(din) ** (-0.5)
        kw, kb = jax.random.split(k)
        w = jax.random.uniform(kw, (din, dout), jnp.float32, -bound, bound)
        b = jax.random.uniform(kb, (dout,), jnp.float32, -bound, bound)
        return w, b

    w_qkv_in, b_qkv_in = lin(keys[0], INPUT_DIM, 3 * DIM)
    w_qkv_ctx, b_qkv_ctx = lin(keys[1], CONTEXT_DIM, 3 * DIM)
    w_out_in, b_out_in = lin(keys[2], DIM, INPUT_DIM)
    w_out_ctx, b_out_ctx = lin(keys[3], DIM, CONTEXT_DIM)

    # Pad output projections to OUT_W=128 columns (zeros beyond the true width) so the
    # fused kernel's final store is unmasked / lane-dense; sliced back in the wrapper.
    def pad_w(w):
        return jnp.zeros((DIM, OUT_W), jnp.float32).at[:, : w.shape[1]].set(w)

    def pad_b(bvec):
        return jnp.zeros((1, OUT_W), jnp.float32).at[0, : bvec.shape[0]].set(bvec)

    return {
        "w_qkv_in": w_qkv_in,
        "b_qkv_in": b_qkv_in.reshape(1, -1),
        "w_qkv_ctx": w_qkv_ctx,
        "b_qkv_ctx": b_qkv_ctx.reshape(1, -1),
        # QKNorm scales packed as rows: [q_in, k_in, q_ctx, k_ctx], init to ones.
        "g_qk": jnp.ones((4, DIM), jnp.float32),
        "w_out_ctx_pad": pad_w(w_out_ctx),
        "b_out_ctx_pad": pad_b(b_out_ctx),
        "w_out_in_pad": pad_w(w_out_in),
        "b_out_in_pad": pad_b(b_out_in),
    }


def rope_table(n, rotary_dim, base):
    """Packed (n, 2*rotary_dim) table: [:, :rd] = cos, [:, rd:] = sin (rotate_half layout)."""
    inv_freq = 1.0 / (
        base ** (jnp.arange(0, rotary_dim, 2, dtype=jnp.float32) / rotary_dim)
    )
    t = jnp.arange(n, dtype=jnp.float32)
    freqs = jnp.outer(t, inv_freq)                                   # (n, rd // 2)
    cos = jnp.concatenate([jnp.cos(freqs), jnp.cos(freqs)], axis=-1)  # (n, rd)
    sin = jnp.concatenate([jnp.sin(freqs), jnp.sin(freqs)], axis=-1)  # (n, rd)
    return jnp.concatenate([cos, sin], axis=-1)                       # (n, 2*rd)


if __name__ == "__main__":
    key = jax.random.PRNGKey(0)
    kp, ki, kc = jax.random.split(key, 3)
    params = init_params(kp)
    inp = jax.random.normal(ki, (B, S_IN, INPUT_DIM), jnp.float32)
    ctx = jax.random.normal(kc, (B, S_CTX, CONTEXT_DIM), jnp.float32)
    # RoPE tables hoisted out of the jitted forward (computed once per sequence length).
    rope_tab = rope_table(SEQ, ROTARY_DIM, BASE)

    fwd = jax.jit(mmdit_attention_forward)
    out_in, out_ctx = fwd(params, inp, ctx, rope_tab)
    jax.block_until_ready((out_in, out_ctx))

    assert out_in.shape == (B, S_IN, INPUT_DIM)
    assert out_ctx.shape == (B, S_CTX, CONTEXT_DIM)
    assert bool(jnp.all(jnp.isfinite(out_in))) and bool(jnp.all(jnp.isfinite(out_ctx)))
    print("KERNEL_OK")
</pallas_src>

<mosaic_0001>
module attributes {stable_mosaic.version = 11 : i64} {
  func.func @_mmdit_fused_kernel(%arg0: i32, %arg1: memref<1x16x64xf32, #tpu.memory_space<vmem>>, %arg2: memref<1x8x64xf32, #tpu.memory_space<vmem>>, %arg3: memref<64x768xf32, #tpu.memory_space<vmem>>, %arg4: memref<1x768xf32, #tpu.memory_space<vmem>>, %arg5: memref<64x768xf32, #tpu.memory_space<vmem>>, %arg6: memref<1x768xf32, #tpu.memory_space<vmem>>, %arg7: memref<4x256xf32, #tpu.memory_space<vmem>>, %arg8: memref<256x128xf32, #tpu.memory_space<vmem>>, %arg9: memref<1x128xf32, #tpu.memory_space<vmem>>, %arg10: memref<256x128xf32, #tpu.memory_space<vmem>>, %arg11: memref<1x128xf32, #tpu.memory_space<vmem>>, %arg12: memref<24x256xf32, #tpu.memory_space<vmem>>, %arg13: memref<1x24x128xf32, #tpu.memory_space<vmem>>) attributes {dimension_semantics = [#tpu.dimension_semantics<parallel>], iteration_bounds = array<i64: 2>, scalar_prefetch = 0 : i64, scratch_operands = 0 : i64, tpu.core_type = #tpu.core_type<tc>, window_params = [{transform_indices = @transform_0, window_bounds = array<i64: 1, 16, 64>}, {transform_indices = @transform_1, window_bounds = array<i64: 1, 8, 64>}, {pipeline_mode = #tpu.pipeline_mode<synchronous>, transform_indices = @transform_2, window_bounds = array<i64: 64, 768>}, {pipeline_mode = #tpu.pipeline_mode<synchronous>, transform_indices = @transform_3, window_bounds = array<i64: 1, 768>}, {pipeline_mode = #tpu.pipeline_mode<synchronous>, transform_indices = @transform_4, window_bounds = array<i64: 64, 768>}, {pipeline_mode = #tpu.pipeline_mode<synchronous>, transform_indices = @transform_5, window_bounds = array<i64: 1, 768>}, {pipeline_mode = #tpu.pipeline_mode<synchronous>, transform_indices = @transform_6, window_bounds = array<i64: 4, 256>}, {pipeline_mode = #tpu.pipeline_mode<synchronous>, transform_indices = @transform_7, window_bounds = array<i64: 256, 128>}, {pipeline_mode = #tpu.pipeline_mode<synchronous>, transform_indices = @transform_8, window_bounds = array<i64: 1, 128>}, {pipeline_mode = #tpu.pipeline_mode<synchronous>, transform_indices = @transform_9, window_bounds = array<i64: 256, 128>}, {pipeline_mode = #tpu.pipeline_mode<synchronous>, transform_indices = @transform_10, window_bounds = array<i64: 1, 128>}, {pipeline_mode = #tpu.pipeline_mode<synchronous>, transform_indices = @transform_11, window_bounds = array<i64: 24, 256>}, {transform_indices = @transform_12, window_bounds = array<i64: 1, 24, 128>}]} {
    %c0 = arith.constant 0 : index
    %c0_0 = arith.constant 0 : index
    %c0_1 = arith.constant 0 : index
    %0 = vector.load %arg1[%c0, %c0_0, %c0_1] : memref<1x16x64xf32, #tpu.memory_space<vmem>>, vector<1x16x64xf32>
    %1 = vector.shape_cast %0 : vector<1x16x64xf32> to vector<16x64xf32>
    %c0_2 = arith.constant 0 : index
    %c0_3 = arith.constant 0 : index
    %2 = vector.load %arg3[%c0_2, %c0_3] : memref<64x768xf32, #tpu.memory_space<vmem>>, vector<64x768xf32>
    %cst = arith.constant dense<0.000000e+00> : vector<16x768xf32>
    %3 = tpu.matmul %1, %2, %cst {dimension_numbers = #tpu.dot_dimension_numbers<[1], [0], [0], [1], [0, 0, 1, 1], [], []>} : vector<16x64xf32>, vector<64x768xf32>, vector<16x768xf32> -> vector<16x768xf32>
    %c0_4 = arith.constant 0 : index
    %c0_5 = arith.constant 0 : index
    %4 = vector.load %arg4[%c0_4, %c0_5] : memref<1x768xf32, #tpu.memory_space<vmem>>, vector<1x768xf32>
    %5 = vector.broadcast %4 : vector<1x768xf32> to vector<16x768xf32>
    %6 = arith.addf %3, %5 : vector<16x768xf32>
    %c0_6 = arith.constant 0 : index
    %c0_7 = arith.constant 0 : index
    %c0_8 = arith.constant 0 : index
    %7 = vector.load %arg2[%c0_6, %c0_7, %c0_8] : memref<1x8x64xf32, #tpu.memory_space<vmem>>, vector<1x8x64xf32>
    %8 = vector.shape_cast %7 : vector<1x8x64xf32> to vector<8x64xf32>
    %c0_9 = arith.constant 0 : index
    %c0_10 = arith.constant 0 : index
    %9 = vector.load %arg5[%c0_9, %c0_10] : memref<64x768xf32, #tpu.memory_space<vmem>>, vector<64x768xf32>
    %cst_11 = arith.constant dense<0.000000e+00> : vector<8x768xf32>
    %10 = tpu.matmul %8, %9, %cst_11 {dimension_numbers = #tpu.dot_dimension_numbers<[1], [0], [0], [1], [0, 0, 1, 1], [], []>} : vector<8x64xf32>, vector<64x768xf32>, vector<8x768xf32> -> vector<8x768xf32>
    %c0_12 = arith.constant 0 : index
    %c0_13 = arith.constant 0 : index
    %11 = vector.load %arg6[%c0_12, %c0_13] : memref<1x768xf32, #tpu.memory_space<vmem>>, vector<1x768xf32>
    %12 = vector.broadcast %11 : vector<1x768xf32> to vector<8x768xf32>
    %13 = arith.addf %10, %12 : vector<8x768xf32>
    %14 = vector.extract_strided_slice %6 {offsets = [0, 0], sizes = [16, 256], strides = [1, 1]} : vector<16x768xf32> to vector<16x256xf32>
    %15 = vector.extract_strided_slice %6 {offsets = [0, 256], sizes = [16, 256], strides = [1, 1]} : vector<16x768xf32> to vector<16x256xf32>
    %16 = vector.extract_strided_slice %6 {offsets = [0, 512], sizes = [16, 256], strides = [1, 1]} : vector<16x768xf32> to vector<16x256xf32>
    %17 = vector.extract_strided_slice %13 {offsets = [0, 0], sizes = [8, 256], strides = [1, 1]} : vector<8x768xf32> to vector<8x256xf32>
    %18 = vector.extract_strided_slice %13 {offsets = [0, 256], sizes = [8, 256], strides = [1, 1]} : vector<8x768xf32> to vector<8x256xf32>
    %19 = vector.extract_strided_slice %13 {offsets = [0, 512], sizes = [8, 256], strides = [1, 1]} : vector<8x768xf32> to vector<8x256xf32>
    %c0_14 = arith.constant 0 : index
    %c0_15 = arith.constant 0 : index
    %20 = vector.load %arg7[%c0_14, %c0_15] : memref<4x256xf32, #tpu.memory_space<vmem>>, vector<1x256xf32>
    %21 = arith.mulf %14, %14 : vector<16x256xf32>
    %cst_16 = arith.constant dense<0.000000e+00> : vector<16xf32>
    %22 = vector.multi_reduction <add>, %21, %cst_16 [1] : vector<16x256xf32> to vector<16xf32>
    %23 = vector.shape_cast %22 : vector<16xf32> to vector<16x1xf32>
    %cst_17 = arith.constant 2.560000e+02 : f32
    %24 = vector.broadcast %cst_17 : f32 to vector<16x1xf32>
    %25 = arith.divf %23, %24 : vector<16x1xf32>
    %cst_18 = arith.constant 9.99999997E-7 : f32
    %26 = vector.broadcast %cst_18 : f32 to vector<16x1xf32>
    %27 = arith.addf %25, %26 : vector<16x1xf32>
    %28 = math.rsqrt %27 : vector<16x1xf32>
    %29 = vector.broadcast %28 : vector<16x1xf32> to vector<16x256xf32>
    %30 = arith.mulf %14, %29 : vector<16x256xf32>
    %31 = vector.broadcast %20 : vector<1x256xf32> to vector<16x256xf32>
    %32 = arith.mulf %30, %31 : vector<16x256xf32>
    %c1 = arith.constant 1 : index
    %c0_19 = arith.constant 0 : index
    %33 = vector.load %arg7[%c1, %c0_19] : memref<4x256xf32, #tpu.memory_space<vmem>>, vector<1x256xf32>
    %34 = arith.mulf %15, %15 : vector<16x256xf32>
    %cst_20 = arith.constant dense<0.000000e+00> : vector<16xf32>
    %35 = vector.multi_reduction <add>, %34, %cst_20 [1] : vector<16x256xf32> to vector<16xf32>
    %36 = vector.shape_cast %35 : vector<16xf32> to vector<16x1xf32>
    %cst_21 = arith.constant 2.560000e+02 : f32
    %37 = vector.broadcast %cst_21 : f32 to vector<16x1xf32>
    %38 = arith.divf %36, %37 : vector<16x1xf32>
    %cst_22 = arith.constant 9.99999997E-7 : f32
    %39 = vector.broadcast %cst_22 : f32 to vector<16x1xf32>
    %40 = arith.addf %38, %39 : vector<16x1xf32>
    %41 = math.rsqrt %40 : vector<16x1xf32>
    %42 = vector.broadcast %41 : vector<16x1xf32> to vector<16x256xf32>
    %43 = arith.mulf %15, %42 : vector<16x256xf32>
    %44 = vector.broadcast %33 : vector<1x256xf32> to vector<16x256xf32>
    %45 = arith.mulf %43, %44 : vector<16x256xf32>
    %c2 = arith.constant 2 : index
    %c0_23 = arith.constant 0 : index
    %46 = vector.load %arg7[%c2, %c0_23] : memref<4x256xf32, #tpu.memory_space<vmem>>, vector<1x256xf32>
    %47 = arith.mulf %17, %17 : vector<8x256xf32>
    %cst_24 = arith.constant dense<0.000000e+00> : vector<8xf32>
    %48 = vector.multi_reduction <add>, %47, %cst_24 [1] : vector<8x256xf32> to vector<8xf32>
    %49 = vector.shape_cast %48 : vector<8xf32> to vector<8x1xf32>
    %cst_25 = arith.constant 2.560000e+02 : f32
    %50 = vector.broadcast %cst_25 : f32 to vector<8x1xf32>
    %51 = arith.divf %49, %50 : vector<8x1xf32>
    %cst_26 = arith.constant 9.99999997E-7 : f32
    %52 = vector.broadcast %cst_26 : f32 to vector<8x1xf32>
    %53 = arith.addf %51, %52 : vector<8x1xf32>
    %54 = math.rsqrt %53 : vector<8x1xf32>
    %55 = vector.broadcast %54 : vector<8x1xf32> to vector<8x256xf32>
    %56 = arith.mulf %17, %55 : vector<8x256xf32>
    %57 = vector.broadcast %46 : vector<1x256xf32> to vector<8x256xf32>
    %58 = arith.mulf %56, %57 : vector<8x256xf32>
    %c3 = arith.constant 3 : index
    %c0_27 = arith.constant 0 : index
    %59 = vector.load %arg7[%c3, %c0_27] : memref<4x256xf32, #tpu.memory_space<vmem>>, vector<1x256xf32>
    %60 = arith.mulf %18, %18 : vector<8x256xf32>
    %cst_28 = arith.constant dense<0.000000e+00> : vector<8xf32>
    %61 = vector.multi_reduction <add>, %60, %cst_28 [1] : vector<8x256xf32> to vector<8xf32>
    %62 = vector.shape_cast %61 : vector<8xf32> to vector<8x1xf32>
    %cst_29 = arith.constant 2.560000e+02 : f32
    %63 = vector.broadcast %cst_29 : f32 to vector<8x1xf32>
    %64 = arith.divf %62, %63 : vector<8x1xf32>
    %cst_30 = arith.constant 9.99999997E-7 : f32
    %65 = vector.broadcast %cst_30 : f32 to vector<8x1xf32>
    %66 = arith.addf %64, %65 : vector<8x1xf32>
    %67 = math.rsqrt %66 : vector<8x1xf32>
    %68 = vector.broadcast %67 : vector<8x1xf32> to vector<8x256xf32>
    %69 = arith.mulf %18, %68 : vector<8x256xf32>
    %70 = vector.broadcast %59 : vector<1x256xf32> to vector<8x256xf32>
    %71 = arith.mulf %69, %70 : vector<8x256xf32>
    %72 = tpu.concatenate %58, %32 in 0 : vector<8x256xf32>, vector<16x256xf32> -> vector<24x256xf32>
    %73 = tpu.concatenate %71, %45 in 0 : vector<8x256xf32>, vector<16x256xf32> -> vector<24x256xf32>
    %74 = tpu.concatenate %19, %16 in 0 : vector<8x256xf32>, vector<16x256xf32> -> vector<24x256xf32>
    %c0_31 = arith.constant 0 : index
    %c0_32 = arith.constant 0 : index
    %75 = vector.load %arg12[%c0_31, %c0_32] : memref<24x256xf32, #tpu.memory_space<vmem>>, vector<24x128xf32>
    %c0_33 = arith.constant 0 : index
    %c128 = arith.constant 128 : index
    %76 = vector.load %arg12[%c0_33, %c128] : memref<24x256xf32, #tpu.memory_space<vmem>>, vector<24x128xf32>
    %77 = vector.extract_strided_slice %72 {offsets = [0, 0], sizes = [24, 128], strides = [1, 1]} : vector<24x256xf32> to vector<24x128xf32>
    %cst_34 = arith.constant 0.0883883461 : f32
    %78 = vector.broadcast %cst_34 : f32 to vector<24x128xf32>
    %79 = arith.mulf %77, %78 : vector<24x128xf32>
    %80 = vector.extract_strided_slice %73 {offsets = [0, 0], sizes = [24, 128], strides = [1, 1]} : vector<24x256xf32> to vector<24x128xf32>
    %81 = vector.extract_strided_slice %74 {offsets = [0, 0], sizes = [24, 128], strides = [1, 1]} : vector<24x256xf32> to vector<24x128xf32>
    %82 = arith.mulf %79, %75 : vector<24x128xf32>
    %83 = vector.extract_strided_slice %79 {offsets = [0, 64], sizes = [24, 64], strides = [1, 1]} : vector<24x128xf32> to vector<24x64xf32>
    %cst_35 = arith.constant 0.000000e+00 : f32
    %84 = vector.broadcast %cst_35 : f32 to vector<24x64xf32>
    %85 = arith.subf %84, %83 : vector<24x64xf32>
    %86 = vector.extract_strided_slice %79 {offsets = [0, 0], sizes = [24, 64], strides = [1, 1]} : vector<24x128xf32> to vector<24x64xf32>
    %87 = tpu.concatenate %85, %86 in 1 : vector<24x64xf32>, vector<24x64xf32> -> vector<24x128xf32>
    %88 = arith.mulf %87, %76 : vector<24x128xf32>
    %89 = arith.addf %82, %88 : vector<24x128xf32>
    %90 = arith.mulf %80, %75 : vector<24x128xf32>
    %91 = vector.extract_strided_slice %80 {offsets = [0, 64], sizes = [24, 64], strides = [1, 1]} : vector<24x128xf32> to vector<24x64xf32>
    %cst_36 = arith.constant 0.000000e+00 : f32
    %92 = vector.broadcast %cst_36 : f32 to vector<24x64xf32>
    %93 = arith.subf %92, %91 : vector<24x64xf32>
    %94 = vector.extract_strided_slice %80 {offsets = [0, 0], sizes = [24, 64], strides = [1, 1]} : vector<24x128xf32> to vector<24x64xf32>
    %95 = tpu.concatenate %93, %94 in 1 : vector<24x64xf32>, vector<24x64xf32> -> vector<24x128xf32>
    %96 = arith.mulf %95, %76 : vector<24x128xf32>
    %97 = arith.addf %90, %96 : vector<24x128xf32>
    %cst_37 = arith.constant dense<0.000000e+00> : vector<24x24xf32>
    %98 = tpu.matmul %89, %97, %cst_37 {dimension_numbers = #tpu.dot_dimension_numbers<[1], [1], [0], [0], [0, 0, 1, 0], [], []>} : vector<24x128xf32>, vector<24x128xf32>, vector<24x24xf32> -> vector<24x24xf32>
    %cst_38 = arith.constant dense<0xFF800000> : vector<24xf32>
    %99 = vector.multi_reduction <maximumf>, %98, %cst_38 [1] : vector<24x24xf32> to vector<24xf32>
    %100 = vector.shape_cast %99 : vector<24xf32> to vector<24x1xf32>
    %101 = vector.broadcast %100 : vector<24x1xf32> to vector<24x24xf32>
    %102 = arith.subf %98, %101 : vector<24x24xf32>
    %103 = math.exp %102 : vector<24x24xf32>
    %cst_39 = arith.constant dense<0.000000e+00> : vector<24xf32>
    %104 = vector.multi_reduction <add>, %103, %cst_39 [1] : vector<24x24xf32> to vector<24xf32>
    %105 = vector.shape_cast %104 : vector<24xf32> to vector<24x1xf32>
    %106 = vector.broadcast %105 : vector<24x1xf32> to vector<24x24xf32>
    %107 = arith.divf %103, %106 : vector<24x24xf32>
    %cst_40 = arith.constant dense<0.000000e+00> : vector<24x128xf32>
    %108 = tpu.matmul %107, %81, %cst_40 {dimension_numbers = #tpu.dot_dimension_numbers<[1], [0], [0], [1], [0, 0, 1, 1], [], []>} : vector<24x24xf32>, vector<24x128xf32>, vector<24x128xf32> -> vector<24x128xf32>
    %109 = vector.extract_strided_slice %72 {offsets = [0, 128], sizes = [24, 128], strides = [1, 1]} : vector<24x256xf32> to vector<24x128xf32>
    %cst_41 = arith.constant 0.0883883461 : f32
    %110 = vector.broadcast %cst_41 : f32 to vector<24x128xf32>
    %111 = arith.mulf %109, %110 : vector<24x128xf32>
    %112 = vector.extract_strided_slice %73 {offsets = [0, 128], sizes = [24, 128], strides = [1, 1]} : vector<24x256xf32> to vector<24x128xf32>
    %113 = vector.extract_strided_slice %74 {offsets = [0, 128], sizes = [24, 128], strides = [1, 1]} : vector<24x256xf32> to vector<24x128xf32>
    %114 = arith.mulf %111, %75 : vector<24x128xf32>
    %115 = vector.extract_strided_slice %111 {offsets = [0, 64], sizes = [24, 64], strides = [1, 1]} : vector<24x128xf32> to vector<24x64xf32>
    %cst_42 = arith.constant 0.000000e+00 : f32
    %116 = vector.broadcast %cst_42 : f32 to vector<24x64xf32>
    %117 = arith.subf %116, %115 : vector<24x64xf32>
    %118 = vector.extract_strided_slice %111 {offsets = [0, 0], sizes = [24, 64], strides = [1, 1]} : vector<24x128xf32> to vector<24x64xf32>
    %119 = tpu.concatenate %117, %118 in 1 : vector<24x64xf32>, vector<24x64xf32> -> vector<24x128xf32>
    %120 = arith.mulf %119, %76 : vector<24x128xf32>
    %121 = arith.addf %114, %120 : vector<24x128xf32>
    %122 = arith.mulf %112, %75 : vector<24x128xf32>
    %123 = vector.extract_strided_slice %112 {offsets = [0, 64], sizes = [24, 64], strides = [1, 1]} : vector<24x128xf32> to vector<24x64xf32>
    %cst_43 = arith.constant 0.000000e+00 : f32
    %124 = vector.broadcast %cst_43 : f32 to vector<24x64xf32>
    %125 = arith.subf %124, %123 : vector<24x64xf32>
    %126 = vector.extract_strided_slice %112 {offsets = [0, 0], sizes = [24, 64], strides = [1, 1]} : vector<24x128xf32> to vector<24x64xf32>
    %127 = tpu.concatenate %125, %126 in 1 : vector<24x64xf32>, vector<24x64xf32> -> vector<24x128xf32>
    %128 = arith.mulf %127, %76 : vector<24x128xf32>
    %129 = arith.addf %122, %128 : vector<24x128xf32>
    %cst_44 = arith.constant dense<0.000000e+00> : vector<24x24xf32>
    %130 = tpu.matmul %121, %129, %cst_44 {dimension_numbers = #tpu.dot_dimension_numbers<[1], [1], [0], [0], [0, 0, 1, 0], [], []>} : vector<24x128xf32>, vector<24x128xf32>, vector<24x24xf32> -> vector<24x24xf32>
    %cst_45 = arith.constant dense<0xFF800000> : vector<24xf32>
    %131 = vector.multi_reduction <maximumf>, %130, %cst_45 [1] : vector<24x24xf32> to vector<24xf32>
    %132 = vector.shape_cast %131 : vector<24xf32> to vector<24x1xf32>
    %133 = vector.broadcast %132 : vector<24x1xf32> to vector<24x24xf32>
    %134 = arith.subf %130, %133 : vector<24x24xf32>
    %135 = math.exp %134 : vector<24x24xf32>
    %cst_46 = arith.constant dense<0.000000e+00> : vector<24xf32>
    %136 = vector.multi_reduction <add>, %135, %cst_46 [1] : vector<24x24xf32> to vector<24xf32>
    %137 = vector.shape_cast %136 : vector<24xf32> to vector<24x1xf32>
    %138 = vector.broadcast %137 : vector<24x1xf32> to vector<24x24xf32>
    %139 = arith.divf %135, %138 : vector<24x24xf32>
    %cst_47 = arith.constant dense<0.000000e+00> : vector<24x128xf32>
    %140 = tpu.matmul %139, %113, %cst_47 {dimension_numbers = #tpu.dot_dimension_numbers<[1], [0], [0], [1], [0, 0, 1, 1], [], []>} : vector<24x24xf32>, vector<24x128xf32>, vector<24x128xf32> -> vector<24x128xf32>
    %141 = tpu.concatenate %108, %140 in 1 : vector<24x128xf32>, vector<24x128xf32> -> vector<24x256xf32>
    %142 = vector.extract_strided_slice %141 {offsets = [0, 0], sizes = [8, 256], strides = [1, 1]} : vector<24x256xf32> to vector<8x256xf32>
    %c0_48 = arith.constant 0 : index
    %c0_49 = arith.constant 0 : index
    %143 = vector.load %arg8[%c0_48, %c0_49] : memref<256x128xf32, #tpu.memory_space<vmem>>, vector<256x128xf32>
    %cst_50 = arith.constant dense<0.000000e+00> : vector<8x128xf32>
    %144 = tpu.matmul %142, %143, %cst_50 {dimension_numbers = #tpu.dot_dimension_numbers<[1], [0], [0], [1], [0, 0, 1, 1], [], []>} : vector<8x256xf32>, vector<256x128xf32>, vector<8x128xf32> -> vector<8x128xf32>
    %c0_51 = arith.constant 0 : index
    %c0_52 = arith.constant 0 : index
    %145 = vector.load %arg9[%c0_51, %c0_52] : memref<1x128xf32, #tpu.memory_space<vmem>>, vector<1x128xf32>
    %146 = vector.broadcast %145 : vector<1x128xf32> to vector<8x128xf32>
    %147 = arith.addf %144, %146 : vector<8x128xf32>
    %c0_53 = arith.constant 0 : index
    %c0_54 = arith.constant 0 : index
    %c0_55 = arith.constant 0 : index
    %148 = vector.load %arg13[%c0_53, %c0_54, %c0_55] : memref<1x24x128xf32, #tpu.memory_space<vmem>>, vector<1x8x128xf32>
    %149 = vector.shape_cast %148 : vector<1x8x128xf32> to vector<8x128xf32>
    %150 = vector.shape_cast %147 : vector<8x128xf32> to vector<1x8x128xf32>
    tpu.vector_store %arg13[%c0_53, %c0_54, %c0_55], %150 {strides = array<i32>} : memref<1x24x128xf32, #tpu.memory_space<vmem>>, vector<1x8x128xf32>,
    %151 = vector.extract_strided_slice %141 {offsets = [8, 0], sizes = [16, 256], strides = [1, 1]} : vector<24x256xf32> to vector<16x256xf32>
    %c0_56 = arith.constant 0 : index
    %c0_57 = arith.constant 0 : index
    %152 = vector.load %arg10[%c0_56, %c0_57] : memref<256x128xf32, #tpu.memory_space<vmem>>, vector<256x128xf32>
    %cst_58 = arith.constant dense<0.000000e+00> : vector<16x128xf32>
    %153 = tpu.matmul %151, %152, %cst_58 {dimension_numbers = #tpu.dot_dimension_numbers<[1], [0], [0], [1], [0, 0, 1, 1], [], []>} : vector<16x256xf32>, vector<256x128xf32>, vector<16x128xf32> -> vector<16x128xf32>
    %c0_59 = arith.constant 0 : index
    %c0_60 = arith.constant 0 : index
    %154 = vector.load %arg11[%c0_59, %c0_60] : memref<1x128xf32, #tpu.memory_space<vmem>>, vector<1x128xf32>
    %155 = vector.broadcast %154 : vector<1x128xf32> to vector<16x128xf32>
    %156 = arith.addf %153, %155 : vector<16x128xf32>
    %c0_61 = arith.constant 0 : index
    %c8 = arith.constant 8 : index
    %c0_62 = arith.constant 0 : index
    %157 = vector.load %arg13[%c0_61, %c8, %c0_62] : memref<1x24x128xf32, #tpu.memory_space<vmem>>, vector<1x16x128xf32>
    %158 = vector.shape_cast %157 : vector<1x16x128xf32> to vector<16x128xf32>
    %159 = vector.shape_cast %156 : vector<16x128xf32> to vector<1x16x128xf32>
    tpu.vector_store %arg13[%c0_61, %c8, %c0_62], %159 {strides = array<i32>} : memref<1x24x128xf32, #tpu.memory_space<vmem>>, vector<1x16x128xf32>,
    return
  }
  func.func @transform_0(%arg0: i32) -> (i32, i32, i32) {
    %c0_i32 = arith.constant 0 : i32
    %c0_i32_0 = arith.constant 0 : i32
    %c0_i32_1 = arith.constant 0 : i32
    return %arg0, %c0_i32, %c0_i32_0 : i32, i32, i32
  }
  func.func @transform_1(%arg0: i32) -> (i32, i32, i32) {
    %c0_i32 = arith.constant 0 : i32
    %c0_i32_0 = arith.constant 0 : i32
    %c0_i32_1 = arith.constant 0 : i32
    return %arg0, %c0_i32, %c0_i32_0 : i32, i32, i32
  }
  func.func @transform_2(%arg0: i32) -> (i32, i32) {
    %c0_i32 = arith.constant 0 : i32
    %c0_i32_0 = arith.constant 0 : i32
    %c0_i32_1 = arith.constant 0 : i32
    return %c0_i32, %c0_i32_0 : i32, i32
  }
  func.func @transform_3(%arg0: i32) -> (i32, i32) {
    %c0_i32 = arith.constant 0 : i32
    %c0_i32_0 = arith.constant 0 : i32
    %c0_i32_1 = arith.constant 0 : i32
    return %c0_i32, %c0_i32_0 : i32, i32
  }
  func.func @transform_4(%arg0: i32) -> (i32, i32) {
    %c0_i32 = arith.constant 0 : i32
    %c0_i32_0 = arith.constant 0 : i32
    %c0_i32_1 = arith.constant 0 : i32
    return %c0_i32, %c0_i32_0 : i32, i32
  }
  func.func @transform_5(%arg0: i32) -> (i32, i32) {
    %c0_i32 = arith.constant 0 : i32
    %c0_i32_0 = arith.constant 0 : i32
    %c0_i32_1 = arith.constant 0 : i32
    return %c0_i32, %c0_i32_0 : i32, i32
  }
  func.func @transform_6(%arg0: i32) -> (i32, i32) {
    %c0_i32 = arith.constant 0 : i32
    %c0_i32_0 = arith.constant 0 : i32
    %c0_i32_1 = arith.constant 0 : i32
    return %c0_i32, %c0_i32_0 : i32, i32
  }
  func.func @transform_7(%arg0: i32) -> (i32, i32) {
    %c0_i32 = arith.constant 0 : i32
    %c0_i32_0 = arith.constant 0 : i32
    %c0_i32_1 = arith.constant 0 : i32
    return %c0_i32, %c0_i32_0 : i32, i32
  }
  func.func @transform_8(%arg0: i32) -> (i32, i32) {
    %c0_i32 = arith.constant 0 : i32
    %c0_i32_0 = arith.constant 0 : i32
    %c0_i32_1 = arith.constant 0 : i32
    return %c0_i32, %c0_i32_0 : i32, i32
  }
  func.func @transform_9(%arg0: i32) -> (i32, i32) {
    %c0_i32 = arith.constant 0 : i32
    %c0_i32_0 = arith.constant 0 : i32
    %c0_i32_1 = arith.constant 0 : i32
    return %c0_i32, %c0_i32_0 : i32, i32
  }
  func.func @transform_10(%arg0: i32) -> (i32, i32) {
    %c0_i32 = arith.constant 0 : i32
    %c0_i32_0 = arith.constant 0 : i32
    %c0_i32_1 = arith.constant 0 : i32
    return %c0_i32, %c0_i32_0 : i32, i32
  }
  func.func @transform_11(%arg0: i32) -> (i32, i32) {
    %c0_i32 = arith.constant 0 : i32
    %c0_i32_0 = arith.constant 0 : i32
    %c0_i32_1 = arith.constant 0 : i32
    return %c0_i32, %c0_i32_0 : i32, i32
  }
  func.func @transform_12(%arg0: i32) -> (i32, i32, i32) {
    %c0_i32 = arith.constant 0 : i32
    %c0_i32_0 = arith.constant 0 : i32
    %c0_i32_1 = arith.constant 0 : i32
    return %arg0, %c0_i32, %c0_i32_0 : i32, i32, i32
  }
}

</mosaic_0001>

<bundles_post_ra>
// kernel: mmdit_attention_forward.1
= control target key start
LH: loop header
LB: loop body
LE: loop exit
PB: predicated region body
PF: predicated region fallthrough
CT: control target
= control target key end

     0   :  { %s3649_s0 = inlined_call_operand.hbm [shape: f32[2,16,64], index: 0, kind: input, shape index: {}]   ;;  %s3650_s1 = inlined_call_operand.vmem [shape: f32[2,8,64], index: 1, kind: input, shape index: {}]   ;;  %s3651_s2 = inlined_call_operand.hbm [shape: f32[64,768], index: 2, kind: input, shape index: {}]   ;;  %s3652_s3 = inlined_call_operand.hbm [shape: f32[1,768], index: 3, kind: input, shape index: {}]   ;;  %s3653_s4 = inlined_call_operand.hbm [shape: f32[64,768], index: 4, kind: input, shape index: {}]   ;;  %s3654_s5 = inlined_call_operand.hbm [shape: f32[1,768], index: 5, kind: input, shape index: {}]   ;;  %s3655_s6 = inlined_call_operand.hbm [shape: f32[4,256], index: 6, kind: input, shape index: {}]   ;;  %s3656_s7 = inlined_call_operand.hbm [shape: f32[256,128], index: 7, kind: input, shape index: {}]   ;;  %s3657_s8 = inlined_call_operand.hbm [shape: f32[1,128], index: 8, kind: input, shape index: {}]   ;;  %s3658_s9 = inlined_call_operand.hbm [shape: f32[256,128], index: 9, kind: input, shape index: {}]   ;;  %s3659_s10 = inlined_call_operand.vmem [shape: f32[1,128], index: 10, kind: input, shape index: {}]   ;;  %s3660_s11 = inlined_call_operand.hbm [shape: f32[24,256], index: 11, kind: input, shape index: {}]   ;;  %s3661_s12 = inlined_call_operand.vmem [shape: f32[2,24,128], index: 12, kind: output, shape index: {}]  }
   0x1   :  { %3667 = sst [smem:[#allocation24_spill]] %s3651_s2 }
   0x2   :  { %3668 = sst [smem:[#allocation25_spill]] %s3652_s3 }
   0x3   :  { %17 = vsyncpa [#allocation3], 0 }
   0x4   :  { %19 = vsyncpa [#allocation3 + $0x1], 0 }
   0x5   :  { %20 = vsyncpa [#allocation5], 0 }
   0x6   :  { %21 = vsyncpa [#allocation8], 0 }
   0x7   :  { %22 = vsyncpa [#allocation11], 0 }
   0x8   :  { %23 = vsyncpa [#allocation14], 0 }
   0x9   :  { %24 = vsyncpa [#allocation17], 0  ;;  %s3062_s21 = smov 0   ;;  %s3064_s22 = smov 0  }
   0xa   :  { %s3066_s23 = smov 0   ;;  %s3068_s24 = smov 0  }
   0xb LB: > { %s2978_s25 = smov [#allocation4]   ;;  %s3083_s27 = sadd.s32 4294967295, %s2976_s24   ;;  %s2976_s24 = sphi %s3068_s24, %s3694_s24   ;;  %s2972_s23 = sphi %s3066_s23, %s3693_s23   ;;  %s2968_s22 = sphi %s3064_s22, %s3692_s22   ;;  %s2964_s21 = sphi %s3062_s21, %s3691_s21  }
   0xc   : > { %s335_s26 = sshll.u32 %s2978_s25, 4  ;;  %p2280_p0 = scmp.ge.s32.totalorder %s2976_s24, 1  ;;  %s336_s26 = int_to_ptr.vmem [resolvable:$true] %s335_s26 }
   0xd   : > { %p3662_p1 = scmp.eq.s32.totalorder %s3083_s27, 0  ;;  %p323_p2 = scmp.lt.s32.totalorder %s2976_s24, 3 }
   0xe   : > { %s2979_s29 = smov [#allocation7]   ;;  %s2980_s14 = smov [#allocation10]  }
   0xf   : > { %p3088_p3 = pnand %p2280_p0, %p323_p2  ;;  %s359_s30 = sshll.u32 %s2979_s29, 4  ;;  %s3100_s30 = int_to_ptr.vmem [resolvable:$true] %s359_s30 }
  0x10   : > { %s384_s15 = sshll.u32 %s2980_s14, 4  ;;  %s2671_s17 = scalar_lea.vmem %s336_s26, 6144  ;;  %s3102_s15 = int_to_ptr.vmem [resolvable:$true] %s384_s15 }
  0x11   : > { %s3669_s28 = scalar_select %p3088_p3, 1, 0 }
  0x12   : > { %p2523_p4 = pneg %p3088_p3  ;;  %p2672_p7 = scmp.ne.s32.totalorder %s336_s26, %s2671_s17 }
  0x13   : > { %p2679_p10 = scmp.lt.s32.totalorder %s336_s26, %s336_s26  ;;  %p2680_p11 = scmp.lt.s32.totalorder %s2671_s17, %s2671_s17 }
  0x14   : > { %p3096_p5 = pnand %p2523_p4, %p3662_p1 }
  0x15   : > { %p2681_p12 = por %p2680_p11, %p2679_p10 }
  0x16   : > { %p3106_p6 = pneg %p3096_p5 }
  0x18   : > { %p2674_p8 = pnand %p2672_p7, %p3106_p6 }
  0x1a   : > { %p2675_p9 = pneg %p2674_p8 }
  0x1c   : > { %p2682_p13 = pnand %p2681_p12, %p2675_p9 }
  0x1e   : > { %2685 = shalt.err (!%p2682_p13)
}
  0x1f   : > { %s2981_s18 = smov 768   ;;  %s2982_s19 = smov 48  }
  0x20   : > { %s3672_s2 = sld [smem:[#allocation24_spill]]  ;;  %s2697_s29 = scalar_lea.vmem %s3100_s30, 6144 }
  0x21   : > { %p2698_p0 = scmp.ne.s32.totalorder %s3100_s30, %s2697_s29  ;;  %p2705_p7 = scmp.lt.s32.totalorder %s3100_s30, %s3100_s30 }
  0x22   : > { %p2706_p8 = scmp.lt.s32.totalorder %s2697_s29, %s2697_s29 }
  0x23   : > { %p2700_p2 = pnand %p2698_p0, %p3106_p6 }
  0x24   : > { %p2707_p9 = por %p2706_p8, %p2705_p7 }
  0x25   : > { %p2701_p4 = pneg %p2700_p2 }
  0x26   : > { %2526 = dma.hbm_to_vmem [thread:$0]  (!%p3096_p5), %s3672_s2, 6144, %s336_s26, [#allocation5], %s2981_s18, %s2981_s18, %s2982_s19  }
  0x27   : > { %p2708_p10 = pnand %p2707_p9, %p2701_p4 }
  0x29   : > { %2711 = shalt.err (!%p2708_p10)
}
  0x2a   : > { %2532 = dma.hbm_to_vmem [thread:$0]  (!%p3096_p5), %s3653_s4, 6144, %s3100_s30, [#allocation8], %s2981_s18, %s2981_s18, %s2982_s19  }
  0x2b   : > { %s2723_s26 = scalar_lea.vmem %s3102_s15, 128  ;;  %p2731_p0 = scmp.lt.s32.totalorder %s3102_s15, %s3102_s15 }
  0x2c   : > { %p2724_p11 = scmp.ne.s32.totalorder %s3102_s15, %s2723_s26  ;;  %p2732_p2 = scmp.lt.s32.totalorder %s2723_s26, %s2723_s26 }
  0x2e   : > { %p2726_p12 = pnand %p2724_p11, %p3106_p6  ;;  %p2733_p4 = por %p2732_p2, %p2731_p0 }
  0x30   : > { %p2727_p13 = pneg %p2726_p12 }
  0x32   : > { %p2734_p7 = pnand %p2733_p4, %p2727_p13 }
  0x34   : > { %2737 = shalt.err (!%p2734_p7)
}
  0x35   : > { %2538 = dma.hbm_to_vmem [thread:$0]  (!%p3096_p5), %s3655_s6, 128, %s3102_s15, [#allocation11]  }
  0x36   : > { %s2983_s30 = smov [#allocation13]   ;;  %s2984_s19 = smov [#allocation6]  }
  0x37   : > { %s408_s18 = sshll.u32 %s2983_s30, 4  ;;  %s349_s29 = sshll.u32 %s2984_s19, 4  ;;  %s409_s18 = int_to_ptr.vmem [resolvable:$true] %s408_s18  ;;  %s350_s29 = int_to_ptr.vmem [resolvable:$true] %s349_s29 }
  0x38   : > { %s2749_s14 = scalar_lea.vmem %s409_s18, 16  ;;  %s2756_s17 = scalar_lea.vmem %s409_s18, 32 }
  0x39   : > { %p2750_p8 = scmp.ne.s32.totalorder %s409_s18, %s2749_s14  ;;  %p2757_p11 = scmp.lt.s32.totalorder %s409_s18, %s409_s18 }
  0x3a   : > { %p2758_p12 = scmp.lt.s32.totalorder %s2756_s17, %s2749_s14 }
  0x3b   : > { %p2752_p9 = pnand %p2750_p8, %p3106_p6 }
  0x3c   : > { %p2759_p13 = por %p2758_p12, %p2757_p11 }
  0x3d   : > { %p2753_p10 = pneg %p2752_p9 }
  0x3f   : > { %p2760_p0 = pnand %p2759_p13, %p2753_p10 }
  0x41   : > { %2763 = shalt.err (!%p2760_p0)
}
  0x42   : > { %2544 = dma.hbm_to_vmem [thread:$0]  (!%p3096_p5), %s3657_s8, 16, %s409_s18, [#allocation14]  }
  0x43   : > { %s2775_s20 = scalar_lea.vmem %s350_s29, 96  ;;  %p2783_p8 = scmp.lt.s32.totalorder %s350_s29, %s350_s29 }
  0x44   : > { %p2776_p2 = scmp.ne.s32.totalorder %s350_s29, %s2775_s20  ;;  %p2784_p9 = scmp.lt.s32.totalorder %s2775_s20, %s2775_s20 }
  0x46   : > { %p2778_p4 = pnand %p2776_p2, %p3106_p6  ;;  %p2785_p1 = por %p2784_p9, %p2783_p8 }
  0x48   : > { %p2779_p7 = pneg %p2778_p4 }
  0x4a   : > { %p2786_p3 = pnand %p2785_p1, %p2779_p7 }
  0x4c   : > { %2789 = shalt.err (!%p2786_p3)
}
  0x4d   : > { %s3673_s3 = sld [smem:[#allocation25_spill]]  ;;  %s2985_s19 = smov [#allocation9]  }
  0x4e   : > { %s373_s18 = sshll.u32 %s2985_s19, 4  ;;  %s2986_s14 = smov [#allocation12]   ;;  %s374_s18 = int_to_ptr.vmem [resolvable:$true] %s373_s18 }
  0x4f   : > { %s394_s17 = sshll.u32 %s2986_s14, 4  ;;  %s2801_s26 = scalar_lea.vmem %s374_s18, 96  ;;  %s395_s17 = int_to_ptr.vmem [resolvable:$true] %s394_s17 }
  0x50   : > { %p2802_p10 = scmp.ne.s32.totalorder %s374_s18, %s2801_s26  ;;  %p2809_p13 = scmp.lt.s32.totalorder %s374_s18, %s374_s18 }
  0x51   : > { %p2810_p1 = scmp.lt.s32.totalorder %s2801_s26, %s2801_s26 }
  0x52   : > { %p2804_p11 = pnand %p2802_p10, %p3106_p6 }
  0x53   : > { %2529 = dma.hbm_to_vmem [thread:$0]  (!%p3096_p5), %s3673_s3, 96, %s350_s29, [#allocation5]  }
  0x54   : > { %p2805_p12 = pneg %p2804_p11  ;;  %p2811_p3 = por %p2810_p1, %p2809_p13 }
  0x56   : > { %p2812_p0 = pnand %p2811_p3, %p2805_p12 }
  0x58   : > { %2815 = shalt.err (!%p2812_p0)
}
  0x59   : > { %2535 = dma.hbm_to_vmem [thread:$0]  (!%p3096_p5), %s3654_s5, 96, %s374_s18, [#allocation8]  }
  0x5a   : > { %s2827_s29 = scalar_lea.vmem %s395_s17, 4096  ;;  %p2835_p8 = scmp.lt.s32.totalorder %s395_s17, %s395_s17 }
  0x5b   : > { %p2828_p2 = scmp.ne.s32.totalorder %s395_s17, %s2827_s29  ;;  %p2836_p9 = scmp.lt.s32.totalorder %s2827_s29, %s2827_s29 }
  0x5d   : > { %p2830_p4 = pnand %p2828_p2, %p3106_p6  ;;  %p2837_p10 = por %p2836_p9, %p2835_p8 }
  0x5f   : > { %p2831_p7 = pneg %p2830_p4 }
  0x61   : > { %p2838_p11 = pnand %p2837_p10, %p2831_p7 }
  0x63   : > { %2841 = shalt.err (!%p2838_p11)
}
  0x64   : > { %s3664_s25 = smov 128   ;;  %s3665_s30 = smov 8  }
  0x65   : > { %2541 = dma.hbm_to_vmem [thread:$0]  (!%p3096_p5), %s3656_s7, 4096, %s395_s17, [#allocation11], %s3664_s25, %s3664_s25, %s3665_s30  }
  0x66   : > { %s2989_s14 = smov [#allocation15]   ;;  %s2990_s15 = smov [#allocation16]  }
  0x67   : > { %s418_s26 = sshll.u32 %s2989_s14, 4  ;;  %s434_s20 = sshll.u32 %s2990_s15, 4  ;;  %s419_s26 = int_to_ptr.vmem [resolvable:$true] %s418_s26  ;;  %s435_s20 = int_to_ptr.vmem [resolvable:$true] %s434_s20 }
  0x68   : > { %s2853_s29 = scalar_lea.vmem %s419_s26, 4096  ;;  %p2861_p3 = scmp.lt.s32.totalorder %s419_s26, %s419_s26 }
  0x69   : > { %p2854_p12 = scmp.ne.s32.totalorder %s419_s26, %s2853_s29  ;;  %p2862_p0 = scmp.lt.s32.totalorder %s2853_s29, %s2853_s29 }
  0x6b   : > { %p2856_p13 = pnand %p2854_p12, %p3106_p6  ;;  %p2863_p2 = por %p2862_p0, %p2861_p3 }
  0x6d   : > { %p2857_p1 = pneg %p2856_p13 }
  0x6f   : > { %p2864_p4 = pnand %p2863_p2, %p2857_p1 }
  0x71   : > { %2867 = shalt.err (!%p2864_p4)
}
  0x72   : > { %2547 = dma.hbm_to_vmem [thread:$0]  (!%p3096_p5), %s3658_s9, 4096, %s419_s26, [#allocation14], %s3664_s25, %s3664_s25, %s3665_s30  }
  0x73   : > { %s2879_s18 = scalar_lea.vmem %s435_s20, 768  ;;  %p2887_p10 = scmp.lt.s32.totalorder %s435_s20, %s435_s20 }
  0x74   : > { %p2880_p7 = scmp.ne.s32.totalorder %s435_s20, %s2879_s18  ;;  %p2888_p11 = scmp.lt.s32.totalorder %s2879_s18, %s2879_s18 }
  0x76   : > { %p2882_p8 = pnand %p2880_p7, %p3106_p6  ;;  %p2889_p12 = por %p2888_p11, %p2887_p10 }
  0x78   : > { %p2883_p9 = pneg %p2882_p8 }
  0x7a   : > { %p2890_p13 = pnand %p2889_p12, %p2883_p9 }
  0x7c   : > { %2893 = shalt.err (!%p2890_p13)
}
  0x7d   : > { %s2991_s14 = smov 256   ;;  %s2992_s16 = smov 16  }
  0x7e   : > { %2550 = dma.hbm_to_vmem [thread:$0]  (!%p3096_p5), %s3660_s11, 768, %s435_s20, [#allocation17], %s2991_s14, %s2991_s14, %s2992_s16  }
  0x7f   : > { %s3190_s29 = sadd.s32 1, %s2976_s24   ;;  %s37_s19 = sadd.s32 1, %s2972_s23 }
  0x80   : > { %s34_s17 = ssub.s32 %s2976_s24, %s3190_s29  ;;  %p44_p1 = scmp.ne.s32.totalorder %s2972_s23, %s2968_s22 }
  0x81   : > { %p35_p6 = scmp.eq.s32.totalorder %s34_s17, 0  ;;  %p45_p3 = scmp.eq.s32.totalorder %s2976_s24, 0 }
  0x82   : > { %p50_p0 = scmp.ne.s32.totalorder %s2968_s22, %s2964_s21  ;;  %p3674_p4 = scmp.eq.s32.totalorder %s3083_s27, 0 }
  0x83   : > { %s3201_s18 = scalar_select %p35_p6, %s2972_s23, %s37_s19  }
  0x84   : > { %p46_p2 = por %p45_p3, %p44_p1  ;;  %p3205_p7 = por %p3674_p4, %p50_p0 }
  0x85   : > { %p2564_p8 = scmp.lt.s32.totalorder %s2976_s24, 2  ;;  %s448_s13 = sand.u32 1, %s2972_s23  }
  0x86   : > { %s3675_s25 = scalar_select %p3205_p7, 1, 0 }
  0x87   : > { %s2291_s20 = sshll.u32 %s448_s13, 4  ;;  %s2326_s14 = sshll.u32 %s2976_s24, 8 }
  0x88   : > { %s3215_s15 = scalar_lea.hbm %s3649_s0, %s2326_s14  ;;  %s452_s21 = scalar_lea.vmem [#allocation2], %s2291_s20 }
  0x89   : > { %s459_s17 = sshll.u32 %s452_s21, 4  ;;  %p3219_p5 = pnand %p2564_p8, %p46_p2  ;;  %s3217_s17 = int_to_ptr.vmem [resolvable:$true] %s459_s17 }
  0x8a   : > { %s3223_s30 = scalar_lea.sflag [#allocation3], %s448_s13  ;;  %s2894_s24 = scalar_lea.hbm %s3215_s15, 256 }
  0x8b   : > { %p2895_p9 = scmp.ne.s32.totalorder %s3215_s15, %s2894_s24  ;;  %p2896_p10 = pneg %p3219_p5 }
  0x8c   : > { %s2899_s20 = scalar_lea.hbm %s3649_s0, 512  ;;  %p2900_p13 = scmp.lt.s32.totalorder %s3215_s15, %s3649_s0 }
  0x8d   : > { %p2897_p11 = pnand %p2896_p10, %p2895_p9  ;;  %p2901_p6 = scmp.lt.s32.totalorder %s2899_s20, %s2894_s24 }
  0x8f   : > { %p2898_p12 = pneg %p2897_p11  ;;  %p2902_p1 = por %p2901_p6, %p2900_p13 }
  0x91   : > { %p2903_p3 = pnand %p2902_p1, %p2898_p12 }
  0x93   : > { %2906 = shalt.err (!%p2903_p3)
}
  0x94   : > { %s2907_s13 = scalar_lea.vmem %s3217_s17, 256  ;;  %s2993_s2 = smov [#allocation2]  }
  0x95   : > { %p2908_p0 = scmp.ne.s32.totalorder %s3217_s17, %s2907_s13  ;;  %s2912_s3 = sshll.u32 %s2993_s2, 4  ;;  %s2913_s3 = int_to_ptr.vmem [resolvable:$false] %s2912_s3 }
  0x96   : > { %s2914_s14 = scalar_lea.vmem %s2913_s3, 512  ;;  %p2915_p8 = scmp.lt.s32.totalorder %s3217_s17, %s2913_s3 }
  0x97   : > { %p2910_p2 = pnand %p2908_p0, %p2896_p10  ;;  %p2916_p9 = scmp.lt.s32.totalorder %s2914_s14, %s2907_s13 }
  0x99   : > { %p2911_p4 = pneg %p2910_p2  ;;  %p2917_p11 = por %p2916_p9, %p2915_p8 }
  0x9b   : > { %p2918_p7 = pnand %p2917_p11, %p2911_p4 }
  0x9d   : > { %2921 = shalt.err (!%p2918_p7)
}
  0x9e   : > { %s3677_s24 = smov 8   ;;  %s3678_s16 = smov 128  }
  0x9f   : > { %2554 = dma.hbm_to_vmem [thread:$0]  (!%p3219_p5), %s3215_s15, 256, %s3217_s17, %s3223_s30, %s3678_s16, %s3678_s16, %s3677_s24  }
  0xa0   : > { %p3679_p10 = scmp.ne.s32.totalorder %s3669_s28, 0 }
  0xa1   : > { %s480_s2 = sand.u32 (!%p3679_p10), 1, %s2968_s22   ;;  %p3680_p7 = scmp.ne.s32.totalorder (!%p3679_p10), %s3675_s25, 0 }
  0xa2   : > { %478 = sbr.rel (%p3679_p10) target bundleno = 2148 (0x864), region = 68  ;;  %s3250_s3 = sshll.u32 (!%p3679_p10), %s480_s2, 4 }
  0xa3   : > { %s481_s20 = scalar_lea.sflag (!%p3679_p10), [#allocation3], %s480_s2  ;;  %s484_s26 = scalar_lea.vmem (!%p3679_p10), [#allocation2], %s3250_s3 }
  0xa7   : > { %2939 = dma.done.wait (%p3680_p7), %s481_s20, 256  }
  0xa8   : > { %2941 = vsyncadd (%p3680_p7), %s481_s20, 4294967040  ;;  %p3681_p12 = scmp.eq.s32.totalorder %s3083_s27, 0 }
  0xaa   : > { %2943 = dma.done.wait (%p3681_p12), [#allocation5], 6240   ;;  %p3682_p5 = pmov %p3681_p12 }
  0xac   : > { %2945 = vsyncadd (%p3682_p5), [#allocation5], 4294961056  ;;  %p3683_p13 = pmov %p3682_p5 }
  0xad   : > { %p3684_p6 = pmov %p3682_p5 }
  0xae   : > { %2947 = dma.done.wait (%p3683_p13), [#allocation8], 6240  }
  0xaf   : > { %2949 = vsyncadd (%p3684_p6), [#allocation8], 4294961056  ;;  %p3685_p1 = pmov %p3682_p5 }
  0xb1   : > { %2951 = dma.done.wait (%p3685_p1), [#allocation11], 4224   ;;  %p3686_p3 = pmov %p3685_p1 }
  0xb2   : > { %p3687_p0 = pmov %p3685_p1 }
  0xb3   : > { %2953 = vsyncadd (%p3686_p3), [#allocation11], 4294963072 }
  0xb4   : > { %2955 = dma.done.wait (%p3687_p0), [#allocation14], 4112   ;;  %p3688_p2 = pmov %p3687_p0 }
  0xb5   : > { %p3689_p4 = pmov %p3687_p0 }
  0xb6   : > { %2957 = vsyncadd (%p3688_p2), [#allocation14], 4294963184 }
  0xb7   : > { %2959 = dma.done.wait (%p3689_p4), [#allocation17], 768   ;;  %p3690_p8 = pmov %p3687_p0 }
  0xb8   : > { %v2994_v0 = vmov 0.0   ;;  %v619_v1 = vld [vmem:[#allocation4 + $0x158] sm:$0xff]  ;;  %v621_v2 = vld [vmem:[#allocation4 + $0x168] sm:$0xff]  ;;  %v618_v3 = vld [vmem:[#allocation4 + $0x150] sm:$0xff]  ;;  %vm656_vm0 = vcmask 523264   ;;  %p565_p9 = scmp.lt.s32.totalorder %s3083_s27, 1 }
  0xb9   : > { %2961 = vsyncadd (%p3690_p8), [#allocation17], 4294966528  ;;  %727 = vmatprep.mubr.f32.mxu0 %v2994_v0  ;;  %804 = vmatprep.mubr.f32.mxu1 %v2994_v0  ;;  %v620_v4 = vld [vmem:[#allocation4 + $0x160] sm:$0xff]  ;;  %v613_v5 = vld [vmem:[#allocation4 + $0x128] sm:$0xff]  ;;  %s2995_s17 = smov 64   ;;  %vm2996_vm1 = vmmov 0  }
  0xba   : > { %679 = vmatprep.subr.mxu0 %v619_v1  ;;  %756 = vmatprep.subr.mxu1 %v621_v2  ;;  %v615_v6 = vld [vmem:[#allocation4 + $0x138] sm:$0xff]  ;;  %v612_v7 = vld [vmem:[#allocation4 + $0x120] sm:$0xff]  ;;  %v614_v8 = vld [vmem:[#allocation4 + $0x130] sm:$0xff]  ;;  %s3696_s27 = smov (!%p565_p9, %s3083_s27), 1  ;;  %vm1482_vm2 = vcmask 195584  }
  0xbb   : > { %680 = vmatpush1.msra.mxu0 %v618_v3  ;;  %757 = vmatpush1.msra.mxu1 %v620_v4  ;;  %v607_v9 = vld [vmem:[#allocation4 + $0xf8] sm:$0xff]  ;;  %v609_v10 = vld [vmem:[#allocation4 + $0x108] sm:$0xff]  ;;  %v606_v11 = vld [vmem:[#allocation4 + $0xf0] sm:$0xff]  ;;  %s2305_s28 = sshll.u32 %s3696_s27, 3  ;;  %s2484_s19 = smul.u32 24, %s3696_s27 }
  0xbc   : > { %681 = vmatprep.subr.mxu0 %v613_v5  ;;  %758 = vmatprep.subr.mxu1 %v615_v6  ;;  %v608_v12 = vld [vmem:[#allocation4 + $0x100] sm:$0xff]  ;;  %v601_v13 = vld [vmem:[#allocation4 + $0xc8] sm:$0xff]  ;;  %v603_v14 = vld [vmem:[#allocation4 + $0xd8] sm:$0xff]  ;;  %s568_s15 = scalar_lea.vmem %s3650_s1, %s2305_s28 }
  0xbd   : > { %682 = vmatpush1.msra.mxu0 %v612_v7  ;;  %759 = vmatpush1.msra.mxu1 %v614_v8  ;;  %v600_v15 = vld [vmem:[#allocation4 + $0xc0] sm:$0xff]  ;;  %v602_v16 = vld [vmem:[#allocation4 + $0xd0] sm:$0xff]  ;;  %v595_v17 = vld [vmem:[#allocation4 + $0x98] sm:$0xff]  ;;  %s573_s14 = scalar_lea.vmem %s3661_s12, %s2484_s19 }
  0xbe   : > { %683 = vmatprep.subr.mxu0 %v607_v9  ;;  %760 = vmatprep.subr.mxu1 %v609_v10  ;;  %v597_v18 = vld [vmem:[#allocation4 + $0xa8] sm:$0xff]  ;;  %v594_v19 = vld [vmem:[#allocation4 + $0x90] sm:$0xff]  ;;  %v596_v20 = vld [vmem:[#allocation4 + $0xa0] sm:$0xff] }
  0xbf   : > { %684 = vmatpush1.msra.mxu0 %v606_v11  ;;  %761 = vmatpush1.msra.mxu1 %v608_v12  ;;  %v589_v21 = vld [vmem:[#allocation4 + $0x68] sm:$0xff]  ;;  %v591_v22 = vld [vmem:[#allocation4 + $0x78] sm:$0xff]  ;;  %v588_v23 = vld [vmem:[#allocation4 + $0x60] sm:$0xff] }
  0xc0   : > { %685 = vmatprep.subr.mxu0 %v601_v13  ;;  %762 = vmatprep.subr.mxu1 %v603_v14  ;;  %v590_v24 = vld [vmem:[#allocation4 + $0x70] sm:$0xff]  ;;  %v583_v25 = vld [vmem:[#allocation4 + $0x38] sm:$0xff]  ;;  %v585_v26 = vld [vmem:[#allocation4 + $0x48] sm:$0xff] }
  0xc1   : > { %686 = vmatpush1.msra.mxu0 %v600_v15  ;;  %763 = vmatpush1.msra.mxu1 %v602_v16  ;;  %v582_v27 = vld [vmem:[#allocation4 + $0x30] sm:$0xff]  ;;  %v584_v28 = vld [vmem:[#allocation4 + $0x40] sm:$0xff]  ;;  %v577_v29 = vld [vmem:[#allocation4 + $0x8] sm:$0xff] }
  0xc2   : > { %687 = vmatprep.subr.mxu0 %v595_v17  ;;  %764 = vmatprep.subr.mxu1 %v597_v18  ;;  %v579_v30 = vld [vmem:[#allocation4 + $0x18] sm:$0xff]  ;;  %v576_v31 = vld [vmem:[#allocation4] sm:$0xff]  ;;  %v578_v32 = vld [vmem:[#allocation4 + $0x10] sm:$0xff] }
  0xc3   : > { %688 = vmatpush1.msra.mxu0 %v594_v19  ;;  %765 = vmatpush1.msra.mxu1 %v596_v20  ;;  %v3281_v33 = vld [vmem:[%s484_s26] sm:$0xff]  ;;  %v623_v34 = vld [vmem:[#allocation4 + $0x178] sm:$0xff]  ;;  %v617_v36 = vld [vmem:[#allocation4 + $0x148] sm:$0xff] }
  0xc4   : > { %689 = vmatprep.subr.mxu0 %v589_v21  ;;  %766 = vmatprep.subr.mxu1 %v591_v22  ;;  %v622_v35 = vld [vmem:[#allocation4 + $0x170] sm:$0xff]  ;;  %v938_v37 = vld [vmem:[#allocation7 + $0x158] sm:$0xff]  ;;  %v605_v42 = vld [vmem:[#allocation4 + $0xe8] sm:$0xff] }
  0xc5   : > { %690 = vmatpush1.msra.mxu0 %v588_v23  ;;  %767 = vmatpush1.msra.mxu1 %v590_v24  ;;  %v616_v38 = vld [vmem:[#allocation4 + $0x140] sm:$0xff]  ;;  %v3290_v39 = vld [vmem:[%s484_s26 + $0x8] sm:$0xff]  ;;  %v610_v41 = vld [vmem:[#allocation4 + $0x110] sm:$0xff] }
  0xc6   : > { %691 = vmatprep.subr.mxu0 %v583_v25  ;;  %768 = vmatprep.subr.mxu1 %v585_v26  ;;  %v611_v40 = vld [vmem:[#allocation4 + $0x118] sm:$0xff]  ;;  %v604_v44 = vld [vmem:[#allocation4 + $0xe0] sm:$0xff]  ;;  %v932_v45 = vld [vmem:[#allocation7 + $0x128] sm:$0xff] }
  0xc7   : > { %692 = vmatpush1.msra.mxu0 %v582_v27  ;;  %769 = vmatpush1.msra.mxu1 %v584_v28  ;;  %v937_v43 = vld [vmem:[#allocation7 + $0x150] sm:$0xff]  ;;  %v931_v47 = vld [vmem:[#allocation7 + $0x120] sm:$0xff]  ;;  %v926_v49 = vld [vmem:[#allocation7 + $0xf8] sm:$0xff] }
  0xc8   : > { %693 = vmatprep.subr.mxu0 %v577_v29  ;;  %770 = vmatprep.subr.mxu1 %v579_v30  ;;  %v599_v46 = vld [vmem:[#allocation4 + $0xb8] sm:$0xff]  ;;  %v598_v48 = vld [vmem:[#allocation4 + $0xb0] sm:$0xff]  ;;  %v593_v50 = vld [vmem:[#allocation4 + $0x88] sm:$0xff] }
  0xc9   : > { %694 = vmatpush1.msra.mxu0 %v576_v31  ;;  %771 = vmatpush1.msra.mxu1 %v578_v32  ;;  %v925_v51 = vld [vmem:[#allocation7 + $0xf0] sm:$0xff]  ;;  %v592_v52 = vld [vmem:[#allocation4 + $0x80] sm:$0xff]  ;;  %v920_v53 = vld [vmem:[#allocation7 + $0xc8] sm:$0xff] }
  0xca   : > { %2307 = vmatmul.mubr.msk.f32.vlgmr.msra.gmra.mxu0 %vm656_vm0, %v3281_v33  ;;  %2309 = vmatmul.mubr.msk.f32.vlgmr.msra.gmra.mxu1 %vm656_vm0, %v3281_v33  ;;  %v587_v54 = vld [vmem:[#allocation4 + $0x58] sm:$0xff]  ;;  %v919_v55 = vld [vmem:[#allocation7 + $0xc0] sm:$0xff]  ;;  %v586_v56 = vld [vmem:[#allocation4 + $0x50] sm:$0xff] }
  0xcb   : > { %833 = vmatprep.subr.mxu0 %v623_v34  ;;  %810 = vmatprep.mubr.f32.mxu1 %v2994_v0  ;;  %v914_v57 = vld [vmem:[#allocation7 + $0x98] sm:$0xff]  ;;  %v581_v58 = vld [vmem:[#allocation4 + $0x28] sm:$0xff]  ;;  %v913_v59 = vld [vmem:[#allocation7 + $0x90] sm:$0xff] }
  0xcc   : > { %834 = vmatpush1.msra.mxu0 %v622_v35  ;;  %733 = vmatprep.mubr.f32.mxu0 %v2994_v0  ;;  %v580_v60 = vld [vmem:[#allocation4 + $0x20] sm:$0xff]  ;;  %v908_v61 = vld [vmem:[#allocation7 + $0x68] sm:$0xff]  ;;  %v933_v3 = vld [vmem:[#allocation7 + $0x130] sm:$0xff] }
  0xcd   : > { %835 = vmatprep.subr.mxu0 %v617_v36  ;;  %994 = vmatprep.subr.mxu1 %v938_v37  ;;  %v940_v62 = vld [vmem:[#allocation7 + $0x168] sm:$0xff]  ;;  %v939_v63 = vld [vmem:[#allocation7 + $0x160] sm:$0xff]  ;;  %v934_v1 = vld [vmem:[#allocation7 + $0x138] sm:$0xff]  ;;  %v626_v37 = vlaneseq }
  0xce   : > { %836 = vmatpush1.msra.mxu0 %v616_v38  ;;  %2310 = vmatmul.mubr.msk.f32.gmra.mxu1 %vm656_vm0, %v3290_v39  ;;  %v907_v2 = vld [vmem:[#allocation7 + $0x60] sm:$0xff]  ;;  %v902_v4 = vld [vmem:[#allocation7 + $0x38] sm:$0xff]  ;;  %v928_v5 = vld [vmem:[#allocation7 + $0x108] sm:$0xff] }
  0xcf   : > { %837 = vmatprep.subr.mxu0 %v611_v40  ;;  %2308 = vmatmul.mubr.msk.f32.gmra.mxu0 %vm656_vm0, %v3290_v39  ;;  %v927_v6 = vld [vmem:[#allocation7 + $0x100] sm:$0xff]  ;;  %v901_v7 = vld [vmem:[#allocation7 + $0x30] sm:$0xff]  ;;  %v922_v8 = vld [vmem:[#allocation7 + $0xd8] sm:$0xff]  ;;  %v3321_v38 = vshrl.u32 %v626_v37, 7 }
  0xd0   : > { %838 = vmatpush1.msra.mxu0 %v610_v41  ;;  %881 = vmatprep.mubr.f32.mxu0 %v2994_v0  ;;  %v921_v9 = vld [vmem:[#allocation7 + $0xd0] sm:$0xff]  ;;  %v896_v10 = vld [vmem:[#allocation7 + $0x8] sm:$0xff]  ;;  %v895_v12 = vld [vmem:[#allocation7] sm:$0xff] }
  0xd1   : > { %839 = vmatprep.subr.mxu0 %v605_v42  ;;  %995 = vmatpush1.msra.mxu1 %v937_v43  ;;  %v916_v11 = vld [vmem:[#allocation7 + $0xa8] sm:$0xff]  ;;  %v915_v13 = vld [vmem:[#allocation7 + $0xa0] sm:$0xff]  ;;  %v910_v14 = vld [vmem:[#allocation7 + $0x78] sm:$0xff]  ;;  %v640_v40 = vsub.s32 3, %v3321_v38 }
  0xd2   : > { %840 = vmatpush1.msra.mxu0 %v604_v44  ;;  %996 = vmatprep.subr.mxu1 %v932_v45  ;;  %v909_v15 = vld [vmem:[#allocation7 + $0x70] sm:$0xff]  ;;  %v904_v16 = vld [vmem:[#allocation7 + $0x48] sm:$0xff]  ;;  %v894_v17 = vld [vmem:[%s568_s15] sm:$0xff]  ;;  %v3329_v45 = vsub.s32 0, %v3321_v38 }
  0xd3   : > { %841 = vmatprep.subr.mxu0 %v599_v46  ;;  %997 = vmatpush1.msra.mxu1 %v931_v47  ;;  %v903_v18 = vld [vmem:[#allocation7 + $0x40] sm:$0xff]  ;;  %v898_v19 = vld [vmem:[#allocation7 + $0x18] sm:$0xff]  ;;  %v897_v20 = vld [vmem:[#allocation7 + $0x10] sm:$0xff]  ;;  %v3332_v47 = vsub.s32 1, %v3321_v38 }
  0xd4   : > { %842 = vmatpush1.msra.mxu0 %v598_v48  ;;  %998 = vmatprep.subr.mxu1 %v926_v49  ;;  %v942_v21 = vld [vmem:[#allocation7 + $0x178] sm:$0xff]  ;;  %v941_v22 = vld [vmem:[#allocation7 + $0x170] sm:$0xff]  ;;  %v936_v23 = vld [vmem:[#allocation7 + $0x148] sm:$0xff] }
  0xd5   : > { %843 = vmatprep.subr.mxu0 %v593_v50  ;;  %999 = vmatpush1.msra.mxu1 %v925_v51  ;;  %v935_v24 = vld [vmem:[#allocation7 + $0x140] sm:$0xff]  ;;  %v930_v25 = vld [vmem:[#allocation7 + $0x118] sm:$0xff]  ;;  %v929_v26 = vld [vmem:[#allocation7 + $0x110] sm:$0xff] }
  0xd6   : > { %844 = vmatpush1.msra.mxu0 %v592_v52  ;;  %1000 = vmatprep.subr.mxu1 %v920_v53  ;;  %v924_v27 = vld [vmem:[#allocation7 + $0xe8] sm:$0xff]  ;;  %v923_v28 = vld [vmem:[#allocation7 + $0xe0] sm:$0xff]  ;;  %v918_v29 = vld [vmem:[#allocation7 + $0xb8] sm:$0xff] }
  0xd7   : > { %845 = vmatprep.subr.mxu0 %v587_v54  ;;  %1001 = vmatpush1.msra.mxu1 %v919_v55  ;;  %v917_v30 = vld [vmem:[#allocation7 + $0xb0] sm:$0xff]  ;;  %v912_v31 = vld [vmem:[#allocation7 + $0x88] sm:$0xff]  ;;  %v911_v32 = vld [vmem:[#allocation7 + $0x80] sm:$0xff] }
  0xd8   : > { %846 = vmatpush1.msra.mxu0 %v586_v56  ;;  %1002 = vmatprep.subr.mxu1 %v914_v57  ;;  %v905_v34 = vld [vmem:[#allocation7 + $0x50] sm:$0xff]  ;;  %v900_v35 = vld [vmem:[#allocation7 + $0x28] sm:$0xff]  ;;  %v899_v36 = vld [vmem:[#allocation7 + $0x20] sm:$0xff] }
  0xd9   : > { %847 = vmatprep.subr.mxu0 %v581_v58  ;;  %1003 = vmatpush1.msra.mxu1 %v913_v59  ;;  %v3325_v41 = vld [vmem:[#allocation6] sm:$0x3f] }
  0xda   : > { %848 = vmatpush1.msra.mxu0 %v580_v60  ;;  %1004 = vmatprep.subr.mxu1 %v908_v61  ;;  %v641_v48 = vrot.slane %v3325_v41, %v640_v40  ;;  %v629_v54 = vrot.slane %v3325_v41, %v3329_v45  ;;  %v633_v55 = vrot.slane %v3325_v41, %v3332_v47 }
  0xdb   : > { %2311 = vmatmul.mubr.msk.f32.vlgmr.msra.gmra.mxu0 %vm656_vm0, %v3281_v33  ;;  %1065 = vmatprep.subr.mxu0 %v940_v62  ;;  %v906_v33 = vld [vmem:[#allocation7 + $0x58] sm:$0xff] }
  0xdc   : > { %1066 = vmatpush1.msra.mxu0 %v939_v63  ;;  %887 = vmatprep.mubr.f32.mxu0 %v2994_v0 }
  0xdd   : > { %1067 = vmatprep.subr.mxu0 %v934_v1  ;;  %1005 = vmatpush1.msra.mxu1 %v907_v2 }
  0xde   : > { %1068 = vmatpush1.msra.mxu0 %v933_v3  ;;  %1006 = vmatprep.subr.mxu1 %v902_v4 }
  0xdf   : > { %2312 = vmatmul.mubr.msk.f32.gmra.mxu0 %vm656_vm0, %v3290_v39  ;;  %1069 = vmatprep.subr.mxu0 %v928_v5  ;;  %v636_v39 = vsub.s32 2, %v3321_v38 }
  0xe0   : > { %1070 = vmatpush1.msra.mxu0 %v927_v6  ;;  %1007 = vmatpush1.msra.mxu1 %v901_v7  ;;  %v644_v7 = vsub.s32 4, %v3321_v38 }
  0xe1   : > { %1071 = vmatprep.subr.mxu0 %v922_v8  ;;  %1113 = vmatprep.mubr.f32.mxu0 %v2994_v0  ;;  %v637_v43 = vrot.slane %v3325_v41, %v636_v39 }
  0xe2   : > { %1072 = vmatpush1.msra.mxu0 %v921_v9  ;;  %1008 = vmatprep.subr.mxu1 %v896_v10 }
  0xe3   : > { %1073 = vmatprep.subr.mxu0 %v916_v11  ;;  %1009 = vmatpush1.msra.mxu1 %v895_v12  ;;  %v645_v11 = vrot.slane %v3325_v41, %v644_v7 }
  0xe4   : > { %1074 = vmatpush1.msra.mxu0 %v915_v13  ;;  %1042 = vmatprep.mubr.f32.mxu1 %v2994_v0 }
  0xe5   : > { %1075 = vmatprep.subr.mxu0 %v910_v14  ;;  %2313 = vmatmul.mubr.msk.f32.vlgmr.msra.gmra.mxu1 %vm656_vm0, %v894_v17 }
  0xe6   : > { %1076 = vmatpush1.msra.mxu0 %v909_v15  ;;  %1184 = vmatprep.mubr.f32.mxu1 %v2994_v0  ;;  %v3370_v15 = vld [vmem:[#allocation9] sm:$0x3f] }
  0xe7   : > { %1077 = vmatprep.subr.mxu0 %v904_v16  ;;  %1136 = vmatprep.subr.mxu1 %v942_v21  ;;  %v952_v21 = vrot.slane %v3370_v15, %v3332_v47 }
  0xe8   : > { %1078 = vmatpush1.msra.mxu0 %v903_v18  ;;  %1137 = vmatpush1.msra.mxu1 %v941_v22 }
  0xe9   : > { %1079 = vmatprep.subr.mxu0 %v898_v19  ;;  %1138 = vmatprep.subr.mxu1 %v936_v23  ;;  %v948_v19 = vrot.slane %v3370_v15, %v3329_v45 }
  0xea   : > { %1080 = vmatpush1.msra.mxu0 %v897_v20  ;;  %1139 = vmatpush1.msra.mxu1 %v935_v24  ;;  %v960_v20 = vrot.slane %v3370_v15, %v640_v40 }
  0xeb   : > { %2314 = vmatmul.mubr.msk.f32.vlgmr.msra.gmra.mxu0 %vm656_vm0, %v894_v17  ;;  %2424 = vmatprep.subr.mxu0 %v2994_v0 }
  0xec   : > { %1140 = vmatprep.subr.mxu1 %v930_v25  ;;  %2430 = vmatprep.mubr.msk.f32.mxu0 %vm2996_vm1, %v2994_v0 }
  0xed   : > { %1141 = vmatpush1.msra.mxu1 %v929_v26 }
  0xee   : > { %1142 = vmatprep.subr.mxu1 %v924_v27 }
  0xef   : > { %1143 = vmatpush1.msra.mxu1 %v923_v28 }
  0xf0   : > { %1144 = vmatprep.subr.mxu1 %v918_v29 }
  0xf1   : > { %1145 = vmatpush1.msra.mxu1 %v917_v30 }
  0xf2   : > { %1146 = vmatprep.subr.mxu1 %v912_v31 }
  0xf3   : > { %1147 = vmatpush1.msra.mxu1 %v911_v32 }
  0xf4   : > { %1148 = vmatprep.subr.mxu1 %v906_v33 }
  0xf5   : > { %1149 = vmatpush1.msra.mxu1 %v905_v34 }
  0xf6   : > { %1150 = vmatprep.subr.mxu1 %v900_v35 }
  0xf7   : > { %1151 = vmatpush1.msra.mxu1 %v899_v36 }
  0xf8   : > { %2439 = vmatprep.subr.mxu1 %v2994_v0  ;;  %2315 = vmatmul.mubr.msk.f32.vlgmr.msra.gmra.mxu1 %vm656_vm0, %v894_v17  ;;  %v956_v17 = vrot.slane %v3370_v15, %v636_v39 }
  0xf9   : > { %2445 = vmatprep.mubr.msk.f32.mxu1 %vm2996_vm1, %v2994_v0 }
 0x18a   : > { %v806_v42 = vpop.f32.mrf.mxu1  ;;  %v729_v46 = vpop.f32.mrf.mxu0 }
 0x18b   : > { %v3335_v50 = vadd.f32 %v806_v42, %v637_v43  ;;  %v3355_v63 = vadd.f32 %v729_v46, %v629_v54 }
 0x18c   : > { %v808_v44 = vpop.f32.mrf.mxu1  ;;  %v731_v56 = vpop.f32.mrf.mxu0 }
 0x18d   : > { %v3337_v51 = vadd.f32 %v808_v44, %v641_v48  ;;  %v1230_v59 = vmul.f32 %v3335_v50, %v3335_v50  ;;  %v3357_v1 = vadd.f32 %v731_v56, %v633_v55  ;;  %v1192_v5 = vmul.f32 %v3355_v63, %v3355_v63  ;;  %v1229_v56 = vld [vmem:[#allocation10 + $0x1] ss:$4 sm:$0x3] }
 0x18e   : > { %v812_v49 = vpop.f32.mrf.mxu1 }
 0x18f   : > { %v3339_v52 = vadd.f32 %v812_v49, %v637_v43  ;;  %v1231_v60 = vmul.f32 %v3337_v51, %v3337_v51  ;;  %v735_v61 = vpop.f32.mrf.mxu0  ;;  %v1193_v6 = vmul.f32 %v3357_v1, %v3357_v1 }
 0x190   : > { %v814_v53 = vpop.f32.mrf.mxu1  ;;  %v3393_v31 = vadd.f32 %v735_v61, %v629_v54 }
 0x191   : > { %v3345_v57 = vadd.f32 %v814_v53, %v641_v48  ;;  %v1232_v58 = vmul.f32 %v3339_v52, %v3339_v52  ;;  %v737_v3 = vpop.f32.mrf.mxu0  ;;  %v1234_v4 = vadd.f32 %v1231_v60, %v1230_v59  ;;  %v1196_v10 = vadd.f32 %v1193_v6, %v1192_v5 }
 0x192   : > { %v3395_v32 = vadd.f32 %v737_v3, %v633_v55  ;;  %v1194_v36 = vmul.f32 %v3393_v31, %v3393_v31  ;;  %v1258_v59 = vrot.slane %v1229_v56, %v3332_v47 }
 0x193   : > { %v1233_v62 = vmul.f32 %v3345_v57, %v3345_v57 }
 0x194   : > { %v1195_v37 = vmul.f32 %v3395_v32, %v3395_v32 }
 0x195   : > { %v1237_v2 = vadd.f32 %v1233_v62, %v1232_v58  ;;  %v1254_v58 = vrot.slane %v1229_v56, %v3329_v45 }
 0x196   : > { %v1199_v40 = vadd.f32 %v1195_v37, %v1194_v36 }
 0x197   : > { %1238 = vadd.xlane.f32.xlu0 %v1237_v2 }
 0x19b   : > { %v883_v8 = vpop.f32.mrf.mxu0  ;;  %1235 = vadd.xlane.f32.xlu0 %v1234_v4 }
 0x19c   : > { %v884_v14 = vadd.f32 %v883_v8, %v645_v11  ;;  %v1191_v8 = vld [vmem:[#allocation10] ss:$4 sm:$0x3] }
 0x19d   : > { %v3364_v9 = vpop.f32.mrf.mxu0 }
 0x19f   : > { %v889_v12 = vpop.f32.mrf.mxu0  ;;  %1197 = vadd.xlane.f32.xlu0 %v1196_v10 }
 0x1a0   : > { %v890_v13 = vadd.f32 %v889_v12, %v645_v11  ;;  %v1221_v12 = vrot.slane %v1191_v8, %v3332_v47 }
 0x1a1   : > { %v3374_v18 = vpop.f32.mrf.mxu0 }
 0x1a2   : > { %2440 = vmatpush3.msra.mxu1 %v890_v13 }
 0x1a3   : > { %2441 = vmatprep.subr.mxu1 %v2994_v0 }
 0x1a4   : > { %2442 = vmatpush3.msra.mxu1 %v884_v14 }
 0x1a5   : > { %2443 = vmatprep.subr.mxu1 %v2994_v0  ;;  %v1044_v16 = vpop.f32.mrf.mxu1 }
 0x1a6   : > { %v3383_v26 = vadd.f32 %v1044_v16, %v948_v19 }
 0x1a7   : > { %v1046_v23 = vpop.f32.mrf.mxu1 }
 0x1a8   : > { %v3387_v28 = vadd.f32 %v1046_v23, %v952_v21  ;;  %v1267_v33 = vmul.f32 %v3383_v26, %v3383_v26 }
 0x1aa   : > { %v1268_v34 = vmul.f32 %v3387_v28, %v3387_v28 }
 0x1ab   : > { %v1115_v22 = vpop.f32.mrf.mxu0 }
 0x1ac   : > { %v3381_v24 = vadd.f32 %v1115_v22, %v956_v17  ;;  %v1269_v39 = vadd.f32 %v1268_v34, %v1267_v33 }
 0x1ad   : > { %v1117_v25 = vpop.f32.mrf.mxu0 }
 0x1ae   : > { %v3385_v27 = vadd.f32 %v1117_v25, %v960_v20  ;;  %v1292_v29 = vmul.f32 %v3381_v24, %v3381_v24 }
 0x1b0   : > { %v1293_v30 = vmul.f32 %v3385_v27, %v3385_v27 }
 0x1b2   : > { %v1294_v35 = vadd.f32 %v1293_v30, %v1292_v29  ;;  %v1266_v30 = vld [vmem:[#allocation10 + $0x2] ss:$4 sm:$0x3] }
 0x1b3   : > { %v1281_v37 = vrot.slane %v1266_v30, %v3329_v45 }
 0x1b4   : > { %1295 = vadd.xlane.f32.xlu1 %v1294_v35 }
 0x1b8   : > { %1270 = vadd.xlane.f32.xlu1 %v1269_v39  ;;  %v1217_v39 = vrot.slane %v1191_v8, %v3329_v45 }
 0x1bc   : > { %1200 = vadd.xlane.f32.xlu1 %v1199_v40 }
 0x220   : > { %v1239_v42 = vpop.xlane.xlu0 %1238 }
 0x221   : > { %v1241_v43 = vmul.f32 0.00390625, %v1239_v42 }
 0x223   : > { %v1243_v44 = vadd.f32 1e-06, %v1241_v43 }
 0x224   : > { %v1236_v46 = vpop.xlane.xlu0 %1235 }
 0x225   : > { %2624 = vrsqrt.f32 %v1243_v44  ;;  %v1240_v48 = vmul.f32 0.00390625, %v1236_v46  ;;  %v1285_v46 = vrot.slane %v1266_v30, %v3332_v47  ;;  %v648_v30 = vsub.s32 5, %v3321_v38 }
 0x227   : > { %v1242_v49 = vadd.f32 1e-06, %v1240_v48 }
 0x228   : > { %v1198_v53 = vpop.xlane.xlu0 %1197 }
 0x229   : > { %2626 = vrsqrt.f32 %v1242_v49  ;;  %v1203_v54 = vmul.f32 0.00390625, %v1198_v53 }
 0x22b   : > { %v1205_v55 = vadd.f32 1e-06, %v1203_v54 }
 0x22d   : > { %2628 = vrsqrt.f32 %v1205_v55 }
 0x232   : > { %v2625_v60 = vpop.eup %2624 }
 0x233   : > { %v1248_v61 = vmul.f32 %v2625_v60, %v3339_v52  ;;  %v1249_v62 = vmul.f32 %v2625_v60, %v3345_v57 }
 0x235   : > { %v3409_v2 = vmul.f32 %v1254_v58, %v1248_v61  ;;  %v3411_v3 = vmul.f32 %v1258_v59, %v1249_v62  ;;  %v3463_v61 = vld [vmem:[#allocation16 + $0x28] sm:$0xff] }
 0x236   : > { %v2627_v4 = vpop.eup %2626 }
 0x237   : > { %v1246_v5 = vmul.f32 %v2627_v4, %v3335_v50  ;;  %1388 = vrot.lane.b32.xlu1 %v3409_v2, %s2995_s17  ;;  %v1368_v6 = vsub.f32 0.0, %v3409_v2  ;;  %v1247_v10 = vmul.f32 %v2627_v4, %v3337_v51 }
 0x239   : > { %v3418_v11 = vmul.f32 %v1254_v58, %v1246_v5  ;;  %1376 = vrot.lane.b32.xlu0 %v1368_v6, %s2995_s17  ;;  %v3421_v52 = vmul.f32 %v1258_v59, %v1247_v10 }
 0x23a   : > { %v2629_v57 = vpop.eup %2628 }
 0x23b   : > { %v1367_v50 = vsub.f32 0.0, %v3418_v11  ;;  %v1210_v13 = vmul.f32 %v2629_v57, %v3357_v1  ;;  %v1291_v1 = vld [vmem:[#allocation10 + $0x3] ss:$4 sm:$0x3]  ;;  %v1209_v42 = vmul.f32 %v2629_v57, %v3355_v63 }
 0x23c   : > { %v1306_v29 = vrot.slane %v1291_v1, %v3329_v45  ;;  %v1310_v33 = vrot.slane %v1291_v1, %v3332_v47 }
 0x23d   : > { %v1296_v14 = vpop.xlane.xlu1 %1295  ;;  %1374 = vrot.lane.b32.xlu1 %v1367_v50, %s2995_s17  ;;  %v3427_v17 = vmul.f32 %v1221_v12, %v1210_v13  ;;  %v1224_v48 = vmul.f32 %v1217_v39, %v1209_v42  ;;  %v3471_v50 = vld [vmem:[#allocation16 + $0x18] sm:$0xff] }
 0x23e   : > { %v1297_v16 = vmul.f32 0.00390625, %v1296_v14 }
 0x23f   : > { %v1322_v58 = vmul.f32 0.088388346, %v1224_v48 }
 0x240   : > { %v1298_v51 = vadd.f32 1e-06, %v1297_v16 }
 0x241   : > { %v1271_v19 = vpop.xlane.xlu1 %1270  ;;  %1386 = vrot.lane.b32.xlu1 %v3418_v11, %s2995_s17 }
 0x242   : > { %2630 = vrsqrt.f32 %v1298_v51  ;;  %v1272_v20 = vmul.f32 0.00390625, %v1271_v19  ;;  %v3479_v19 = vld [vmem:[#allocation16] sm:$0xff] }
 0x244   : > { %v1273_v21 = vadd.f32 1e-06, %v1272_v20  ;;  %v3481_v20 = vld [vmem:[#allocation16 + $0x8] sm:$0xff] }
 0x245   : > { %v1201_v22 = vpop.xlane.xlu1 %1200 }
 0x246   : > { %2632 = vrsqrt.f32 %v1273_v21  ;;  %v1204_v23 = vmul.f32 0.00390625, %v1201_v22 }
 0x248   : > { %v1206_v25 = vadd.f32 1e-06, %v1204_v23 }
 0x24a   : > { %2634 = vrsqrt.f32 %v1206_v25 }
 0x24f   : > { %v2631_v34 = vpop.eup %2630 }
 0x250   : > { %v1300_v35 = vmul.f32 %v2631_v34, %v3381_v24  ;;  %v1301_v36 = vmul.f32 %v2631_v34, %v3385_v27 }
 0x252   : > { %v1313_v40 = vmul.f32 %v1306_v29, %v1300_v35  ;;  %v3438_v43 = vmul.f32 %v1310_v33, %v1301_v36 }
 0x253   : > { %v2633_v44 = vpop.eup %2632 }
 0x254   : > { %1384 = vrot.lane.b32.xlu1 %v1313_v40, %s2995_s17  ;;  %v1366_v24 = vsub.f32 0.0, %v1313_v40  ;;  %v1275_v45 = vmul.f32 %v2633_v44, %v3383_v26  ;;  %v1276_v27 = vmul.f32 %v2633_v44, %v3387_v28  ;;  %v1328_v28 = vsub.f32 0.0, %v1322_v58 }
 0x255   : > { %v1363_v25 = vmul.f32 %v3479_v19, %v1313_v40 }
 0x256   : > { %1372 = vrot.lane.b32.xlu0 %v1366_v24, %s2995_s17  ;;  %v1288_v63 = vmul.f32 %v1281_v37, %v1275_v45  ;;  %v3449_v53 = vmul.f32 %v1285_v46, %v1276_v27 }
 0x257   : > { %v2635_v49 = vpop.eup %2634 }
 0x258   : > { %v1321_v54 = vmul.f32 0.088388346, %v1288_v63  ;;  %v1211_v47 = vmul.f32 %v2635_v49, %v3393_v31  ;;  %v1212_v55 = vmul.f32 %v2635_v49, %v3395_v32  ;;  %v3461_v32 = vld [vmem:[#allocation16 + $0x20] sm:$0xff] }
 0x259   : > { %v1365_v6 = vmul.f32 %v3461_v32, %v3409_v2 }
 0x25a   : > { %1345 = vrot.lane.b32.xlu1 %v1321_v54, %s2995_s17  ;;  %v1327_v56 = vsub.f32 0.0, %v1321_v54  ;;  %v1226_v59 = vmul.f32 %v1217_v39, %v1211_v47  ;;  %v3454_v26 = vmul.f32 %v1221_v12, %v1212_v55  ;;  %v3469_v12 = vld [vmem:[#allocation16 + $0x10] sm:$0xff]  ;;  %v1324_v35 = vmul.f32 %v1321_v54, %v3479_v19 }
 0x25b   : > { %v1364_v16 = vmul.f32 %v3469_v12, %v3418_v11  ;;  %v649_v39 = vrot.slane %v3325_v41, %v648_v30  ;;  %v1325_v45 = vmul.f32 %v1322_v58, %v3469_v12 }
 0x25c   : > { %1333 = vrot.lane.b32.xlu0 %v1327_v56, %s2995_s17  ;;  %v1323_v60 = vmul.f32 0.088388346, %v1226_v59 }
 0x25d   : > { %v892_v44 = vadd.f32 %v3374_v18, %v649_v39  ;;  %v886_v27 = vadd.f32 %v3364_v9, %v649_v39 }
 0x25e   : > { %1347 = vrot.lane.b32.xlu1 %v1322_v58, %s2995_s17  ;;  %v1329_v31 = vsub.f32 0.0, %v1323_v60  ;;  %v1326_v54 = vmul.f32 %v1323_v60, %v3461_v32 }
 0x260   : > { %1335 = vrot.lane.b32.xlu0 %v1328_v28, %s2995_s17 }
 0x262   : > { %1349 = vrot.lane.b32.xlu1 %v1323_v60, %s2995_s17 }
 0x264   : > { %1337 = vrot.lane.b32.xlu0 %v1329_v31, %s2995_s17 }
 0x2a9   : > { %v1389_v62 = vpop.permute.xlu1 %1388 }
 0x2ab   : > { %v1377_v4 = vpop.permute.xlu0 %1376 }
 0x2ac   : > { %v1395_v5 = vsel %vm656_vm0, %v1377_v4, %v1389_v62  ;;  %v1651_v4 = vsub.f32 0.0, %v3421_v52 }
 0x2ad   : > { %v1398_v8 = vmul.f32 %v1395_v5, %v3463_v61  ;;  %v1652_v5 = vsub.f32 0.0, %v3411_v3 }
 0x2af   : > { %v1401_v10 = vadd.f32 %v1398_v8, %v1365_v6  ;;  %v1375_v57 = vpop.permute.xlu1 %1374  ;;  %v1650_v6 = vsub.f32 0.0, %v3438_v43  ;;  %v3526_v8 = vmul.f32 0.088388346, %v3449_v53 }
 0x2b1   : > { %2425 = vmatpush3.xpose.msra.mxu0 %v1401_v10  ;;  %v3531_v10 = vmul.f32 0.088388346, %v3427_v17 }
 0x2b2   : > { %2426 = vmatprep.subr.mxu0 %v2994_v0 }
 0x2b3   : > { %v1387_v13 = vpop.permute.xlu1 %1386  ;;  %v1612_v38 = vsub.f32 0.0, %v3531_v10 }
 0x2b4   : > { %v1394_v14 = vsel %vm656_vm0, %v1375_v57, %v1387_v13 }
 0x2b5   : > { %v1397_v51 = vmul.f32 %v1394_v14, %v3471_v50 }
 0x2b7   : > { %v1400_v2 = vadd.f32 %v1397_v51, %v1364_v16 }
 0x2b9   : > { %2427 = vmatpush3.xpose.msra.mxu0 %v1400_v2 }
 0x2ba   : > { %2428 = vmatprep.subr.mxu0 %v2994_v0 }
 0x2c6   : > { %v1385_v21 = vpop.permute.xlu1 %1384 }
 0x2c8   : > { %v1373_v22 = vpop.permute.xlu0 %1372 }
 0x2c9   : > { %v1393_v23 = vsel %vm656_vm0, %v1373_v22, %v1385_v21 }
 0x2ca   : > { %v1396_v1 = vmul.f32 %v1393_v23, %v3481_v20 }
 0x2cc   : > { %v1399_v29 = vadd.f32 %v1396_v1, %v1363_v25  ;;  %v1346_v11 = vpop.permute.xlu1 %1345 }
 0x2ce   : > { %2429 = vmatpush3.xpose.msra.mxu0 %v1399_v29  ;;  %v1334_v33 = vpop.permute.xlu0 %1333 }
 0x2cf   : > { %v1354_v34 = vsel %vm656_vm0, %v1334_v33, %v1346_v11  ;;  %2469 = vmatprep.subr.mxu0 %v2994_v0  ;;  %v964_v33 = vrot.slane %v3370_v15, %v644_v7 }
 0x2d0   : > { %v1357_v36 = vmul.f32 %v1354_v34, %v3481_v20  ;;  %v1348_v37 = vpop.permute.xlu1 %1347  ;;  %v1186_v34 = vpop.f32.mrf.mxu1 }
 0x2d2   : > { %v1360_v40 = vadd.f32 %v1357_v36, %v1324_v35  ;;  %v1336_v42 = vpop.permute.xlu0 %1335  ;;  %v968_v35 = vrot.slane %v3370_v15, %v648_v30  ;;  %v3545_v36 = vmul.f32 0.088388346, %v3454_v26  ;;  %v1188_v39 = vpop.f32.mrf.mxu1 }
 0x2d3   : > { %v1355_v46 = vsel %vm656_vm0, %v1336_v42, %v1348_v37  ;;  %v1187_v37 = vadd.f32 %v1186_v34, %v964_v33 }
 0x2d4   : > { %v1358_v24 = vmul.f32 %v1355_v46, %v3471_v50  ;;  %2431 = vmatmul.mubr.f32.vlgmr.msra.gmra.mxu0 %v1360_v40  ;;  %v1350_v63 = vpop.permute.xlu1 %1349  ;;  %v1611_v40 = vsub.f32 0.0, %v3526_v8  ;;  %v1189_v42 = vadd.f32 %v1188_v39, %v968_v35  ;;  %v1613_v7 = vsub.f32 0.0, %v3545_v36 }
 0x2d5   : > { %2470 = vmatpush3.msra.mxu0 %v892_v44  ;;  %2433 = vmatprep.mubr.msk.f32.mxu0 %vm2996_vm1, %v2994_v0 }
 0x2d6   : > { %2471 = vmatprep.subr.mxu0 %v2994_v0  ;;  %v1338_v41 = vpop.permute.xlu0 %1337  ;;  %v1361_v48 = vadd.f32 %v1358_v24, %v1325_v45  ;;  %2444 = vmatpush3.msra.mxu1 %v1187_v37 }
 0x2d7   : > { %2472 = vmatpush3.msra.mxu0 %v886_v27  ;;  %v1356_v18 = vsel %vm656_vm0, %v1338_v41, %v1350_v63  ;;  %2454 = vmatprep.subr.mxu1 %v2994_v0 }
 0x2d8   : > { %v1359_v49 = vmul.f32 %v1356_v18, %v3463_v61  ;;  %2434 = vmatmul.mubr.f32.gmra.mxu0 %v1361_v48  ;;  %2473 = vmatprep.subr.mxu0 %v2994_v0 }
 0x2d9   : > { %2436 = vmatprep.mubr.msk.f32.mxu0 %vm2996_vm1, %v2994_v0  ;;  %2474 = vmatpush3.msra.mxu0 %v1189_v42 }
 0x2da   : > { %v1362_v9 = vadd.f32 %v1359_v49, %v1326_v54 }
 0x2dc   : > { %2437 = vmatmul.mubr.f32.gmra.mxu0 %v1362_v9 }
 0x2dd   : > { %2475 = vmatprep.mubr.msk.f32.mxu0 %vm2996_vm1, %v2994_v0 }
 0x394   : > { %v1468_v47 = vpop.f32.mrf.mxu0 }
 0x395   : > { %v1483_v55 = vsel %vm1482_vm2, %v1468_v47, -inf }
 0x396   : > { %1484 = vmax.xlane.f32.xlu0 %v1483_v55  ;;  %v2432_v56 = vpop.f32.mrf.mxu0  ;;  %v1649_v55 = vmul.f32 %v3461_v32, %v3411_v3 }
 0x398   : > { %v1473_v58 = vpop.f32.mrf.mxu0 }
 0x399   : > { %v1486_v59 = vsel %vm1482_vm2, %v1473_v58, -inf }
 0x39a   : > { %1487 = vmax.xlane.f32.xlu1 %v1486_v59  ;;  %v2435_v28 = vpop.f32.mrf.mxu0 }
 0x39c   : > { %v1478_v60 = vpop.f32.mrf.mxu0 }
 0x39d   : > { %v1489_v31 = vsel %vm1482_vm2, %v1478_v60, -inf }
 0x39e   : > { %1490 = vmax.xlane.f32.xlu0 %v1489_v31  ;;  %v2438_v62 = vpop.f32.mrf.mxu0  ;;  %v1648_v31 = vmul.f32 %v3469_v12, %v3421_v52 }
 0x3ab   : > { %1672 = vrot.lane.b32.xlu1 %v3411_v3, %s2995_s17 }
 0x3af   : > { %1658 = vrot.lane.b32.xlu1 %v1651_v4, %s2995_s17 }
 0x3b3   : > { %1670 = vrot.lane.b32.xlu1 %v3421_v52, %s2995_s17 }
 0x3b4   : > { %1660 = vrot.lane.b32.xlu0 %v1652_v5, %s2995_s17 }
 0x3b7   : > { %1668 = vrot.lane.b32.xlu1 %v3438_v43, %s2995_s17 }
 0x3b8   : > { %1656 = vrot.lane.b32.xlu0 %v1650_v6, %s2995_s17 }
 0x3bb   : > { %1629 = vrot.lane.b32.xlu1 %v3526_v8, %s2995_s17 }
 0x3bf   : > { %1631 = vrot.lane.b32.xlu1 %v3531_v10, %s2995_s17 }
 0x41f   : > { %v1485_v57 = vpop.xlane.xlu0 %1484 }
 0x420   : > { %v1492_v13 = vsub.f32 %v1468_v47, %v1485_v57 }
 0x422   : > { %v1495_v14 = vmul.f32 1.442695, %v1492_v13  ;;  %v1647_v13 = vmul.f32 %v3479_v19, %v3438_v43 }
 0x423   : > { %v1488_v16 = vpop.xlane.xlu1 %1487 }
 0x424   : > { %2636 = vpow2.f32 %v1495_v14  ;;  %v1493_v51 = vsub.f32 %v1473_v58, %v1488_v16 }
 0x426   : > { %v1497_v2 = vmul.f32 1.442695, %v1493_v51 }
 0x427   : > { %v1491_v21 = vpop.xlane.xlu0 %1490  ;;  %v1673_v15 = vpop.permute.xlu1 %1672 }
 0x428   : > { %2638 = vpow2.f32 %v1497_v2  ;;  %v1494_v53 = vsub.f32 %v1478_v60, %v1491_v21  ;;  %v1608_v2 = vmul.f32 %v3526_v8, %v3479_v19 }
 0x42a   : > { %v1499_v22 = vmul.f32 1.442695, %v1494_v53 }
 0x42b   : > { %v1659_v26 = vpop.permute.xlu1 %1658  ;;  %v1661_v44 = vpop.permute.xlu0 %1660 }
 0x42c   : > { %2640 = vpow2.f32 %v1499_v22  ;;  %v1679_v18 = vsel %vm656_vm0, %v1661_v44, %v1673_v15 }
 0x42d   : > { %v1682_v49 = vmul.f32 %v1679_v18, %v3463_v61 }
 0x42f   : > { %v1671_v30 = vpop.permute.xlu1 %1670  ;;  %v1657_v24 = vpop.permute.xlu0 %1656  ;;  %v1685_v58 = vadd.f32 %v1682_v49, %v1649_v55  ;;  %v1919_v49 = vld [vmem:[#allocation12 + $0xf8] sm:$0xff] }
 0x430   : > { %v1678_v54 = vsel %vm656_vm0, %v1659_v26, %v1671_v30  ;;  %v2029_v55 = vld [vmem:[#allocation15 + $0xf8] sm:$0xff] }
 0x431   : > { %v2637_v23 = vpop.eup %2636  ;;  %v1681_v59 = vmul.f32 %v1678_v54, %v3471_v50  ;;  %v1903_v54 = vld [vmem:[#allocation12 + $0x78] sm:$0xff]  ;;  %2386 = vmatprep.subr.mxu0 %v2029_v55  ;;  %v1904_v55 = vld [vmem:[#allocation12 + $0x80] sm:$0xff] }
 0x432   : > { %v1501_v25 = vsel %vm1482_vm2, %v2637_v23, 0.0 }
 0x433   : > { %1502 = vadd.xlane.f32.xlu0 %v1501_v25  ;;  %v1669_v46 = vpop.permute.xlu1 %1668  ;;  %v1684_v4 = vadd.f32 %v1681_v59, %v1648_v31  ;;  %v1610_v25 = vmul.f32 %v3545_v36, %v3461_v32  ;;  %v1916_v59 = vld [vmem:[#allocation12 + $0xe0] sm:$0xff]  ;;  %v1899_v31 = vld [vmem:[#allocation12 + $0x58] sm:$0xff] }
 0x434   : > { %v1677_v28 = vsel %vm656_vm0, %v1657_v24, %v1669_v46 }
 0x435   : > { %v2639_v17 = vpop.eup %2638  ;;  %v1680_v5 = vmul.f32 %v1677_v28, %v3481_v20  ;;  %v1900_v28 = vld [vmem:[#allocation12 + $0x60] sm:$0xff] }
 0x436   : > { %v1504_v1 = vsel %vm1482_vm2, %v2639_v17, 0.0 }
 0x437   : > { %1505 = vadd.xlane.f32.xlu0 %v1504_v1  ;;  %v1630_v45 = vpop.permute.xlu1 %1629  ;;  %v1683_v16 = vadd.f32 %v1680_v5, %v1647_v13  ;;  %v1897_v5 = vld [vmem:[#allocation12 + $0x48] sm:$0xff]  ;;  %v1911_v13 = vld [vmem:[#allocation12 + $0xb8] sm:$0xff] }
 0x439   : > { %v2641_v29 = vpop.eup %2640 }
 0x43a   : > { %v1507_v11 = vsel %vm1482_vm2, %v2641_v29, 0.0 }
 0x43b   : > { %1508 = vadd.xlane.f32.xlu1 %v1507_v11  ;;  %v1632_v63 = vpop.permute.xlu1 %1631 }
 0x44c   : > { %1633 = vrot.lane.b32.xlu1 %v3545_v36, %s2995_s17 }
 0x44d   : > { %1617 = vrot.lane.b32.xlu0 %v1611_v40, %s2995_s17 }
 0x451   : > { %1619 = vrot.lane.b32.xlu0 %v1612_v38, %s2995_s17 }
 0x455   : > { %1621 = vrot.lane.b32.xlu0 %v1613_v7, %s2995_s17 }
 0x4bc   : > { %v1503_v27 = vpop.xlane.xlu0 %1502 }
 0x4bd   : > { %2642 = vrcp.f32 %v1503_v27 }
 0x4c0   : > { %v1506_v41 = vpop.xlane.xlu0 %1505 }
 0x4c1   : > { %2644 = vrcp.f32 %v1506_v41 }
 0x4c4   : > { %v1509_v48 = vpop.xlane.xlu1 %1508  ;;  %v1618_v9 = vpop.permute.xlu0 %1617 }
 0x4c5   : > { %2646 = vrcp.f32 %v1509_v48  ;;  %v1638_v6 = vsel %vm656_vm0, %v1618_v9, %v1630_v45  ;;  %v1918_v9 = vld [vmem:[#allocation12 + $0xf0] sm:$0xff] }
 0x4c6   : > { %v1641_v52 = vmul.f32 %v1638_v6, %v3481_v20  ;;  %v1912_v6 = vld [vmem:[#allocation12 + $0xc0] sm:$0xff] }
 0x4c8   : > { %v1620_v62 = vpop.permute.xlu0 %1619  ;;  %v1644_v43 = vadd.f32 %v1641_v52, %v1608_v2  ;;  %v1634_v53 = vpop.permute.xlu1 %1633  ;;  %v1895_v52 = vld [vmem:[#allocation12 + $0x38] sm:$0xff]  ;;  %v1893_v2 = vld [vmem:[#allocation12 + $0x28] sm:$0xff] }
 0x4c9   : > { %v1639_v51 = vsel %vm656_vm0, %v1620_v62, %v1632_v63  ;;  %v1914_v62 = vld [vmem:[#allocation12 + $0xd0] sm:$0xff] }
 0x4ca   : > { %v2643_v47 = vpop.eup %2642  ;;  %v1642_v20 = vmul.f32 %v1639_v51, %v3471_v50  ;;  %v1909_v51 = vld [vmem:[#allocation12 + $0xa8] sm:$0xff] }
 0x4cb   : > { %v1511_v56 = vmul.f32 %v2643_v47, %v2637_v23  ;;  %v1609_v23 = vmul.f32 %v3531_v10, %v3469_v12  ;;  %v1902_v47 = vld [vmem:[#allocation12 + $0x70] sm:$0xff] }
 0x4cc   : > { %v1622_v21 = vpop.permute.xlu0 %1621 }
 0x4cd   : > { %2446 = vmatmul.mubr.msk.f32.vlgmr.msra.gmra.mxu1 %vm1482_vm2, %v1511_v56  ;;  %v1640_v22 = vsel %vm656_vm0, %v1622_v21, %v1634_v53  ;;  %v1645_v8 = vadd.f32 %v1642_v20, %v1609_v23  ;;  %v1917_v56 = vld [vmem:[#allocation12 + $0xe8] sm:$0xff]  ;;  %v1908_v21 = vld [vmem:[#allocation12 + $0xa0] sm:$0xff]  ;;  %v1907_v53 = vld [vmem:[#allocation12 + $0x98] sm:$0xff] }
 0x4ce   : > { %v2645_v60 = vpop.eup %2644  ;;  %2455 = vmatpush3.xpose.msra.mxu1 %v1685_v58  ;;  %2448 = vmatprep.mubr.msk.f32.mxu1 %vm2996_vm1, %v2994_v0  ;;  %v1643_v19 = vmul.f32 %v1640_v22, %v3463_v61  ;;  %v1901_v58 = vld [vmem:[#allocation12 + $0x68] sm:$0xff]  ;;  %v1891_v20 = vld [vmem:[#allocation12 + $0x18] sm:$0xff]  ;;  %v1906_v22 = vld [vmem:[#allocation12 + $0x90] sm:$0xff] }
 0x4cf   : > { %2456 = vmatprep.subr.mxu1 %v2994_v0  ;;  %v1513_v3 = vmul.f32 %v2645_v60, %v2639_v17  ;;  %v1915_v60 = vld [vmem:[#allocation12 + $0xd8] sm:$0xff]  ;;  %v1890_v23 = vld [vmem:[#allocation12 + $0x10] sm:$0xff] }
 0x4d0   : > { %v1646_v50 = vadd.f32 %v1643_v19, %v1610_v25  ;;  %v1905_v19 = vld [vmem:[#allocation12 + $0x88] sm:$0xff] }
 0x4d1   : > { %2449 = vmatmul.mubr.msk.f32.gmra.mxu1 %vm1482_vm2, %v1513_v3  ;;  %v1898_v3 = vld [vmem:[#allocation12 + $0x50] sm:$0xff] }
 0x4d2   : > { %v2647_v57 = vpop.eup %2646  ;;  %2457 = vmatpush3.xpose.msra.mxu1 %v1684_v4  ;;  %2451 = vmatprep.mubr.msk.f32.mxu1 %vm2996_vm1, %v2994_v0  ;;  %v1913_v4 = vld [vmem:[#allocation12 + $0xc8] sm:$0xff] }
 0x4d3   : > { %2458 = vmatprep.subr.mxu1 %v2994_v0  ;;  %v1515_v14 = vmul.f32 %v2647_v57, %v2641_v29  ;;  %v1896_v57 = vld [vmem:[#allocation12 + $0x40] sm:$0xff] }
 0x4d5   : > { %2452 = vmatmul.mubr.msk.f32.gmra.mxu1 %vm1482_vm2, %v1515_v14  ;;  %v1910_v14 = vld [vmem:[#allocation12 + $0xb0] sm:$0xff] }
 0x4d6   : > { %2459 = vmatpush3.xpose.msra.mxu1 %v1683_v16  ;;  %2460 = vmatprep.mubr.msk.f32.mxu1 %vm2996_vm1, %v2994_v0  ;;  %v1894_v16 = vld [vmem:[#allocation12 + $0x30] sm:$0xff] }
 0x4d7   : > { %2351 = vmatprep.subr.mxu1 %v1919_v49  ;;  %v2018_v49 = vld [vmem:[#allocation15 + $0xa0] sm:$0xff] }
 0x4d9   : > { %2461 = vmatmul.mubr.f32.vlgmr.msra.gmra.mxu1 %v1644_v43  ;;  %v1892_v43 = vld [vmem:[#allocation12 + $0x20] sm:$0xff] }
 0x4da   : > { %2463 = vmatprep.mubr.msk.f32.mxu1 %vm2996_vm1, %v2994_v0  ;;  %2352 = vmatpush3.msra.mxu1 %v1903_v54  ;;  %v2002_v54 = vld [vmem:[#allocation15 + $0x20] sm:$0xff] }
 0x4db   : > { %2353 = vmatprep.subr.mxu1 %v1918_v9  ;;  %v2017_v9 = vld [vmem:[#allocation15 + $0x98] sm:$0xff] }
 0x4dc   : > { %2354 = vmatpush3.msra.mxu1 %v1902_v47  ;;  %v2001_v47 = vld [vmem:[#allocation15 + $0x18] sm:$0xff] }
 0x4dd   : > { %2464 = vmatmul.mubr.f32.gmra.mxu1 %v1645_v8  ;;  %2355 = vmatprep.subr.mxu1 %v1917_v56  ;;  %v1889_v8 = vld [vmem:[#allocation12 + $0x8] sm:$0xff]  ;;  %v2016_v56 = vld [vmem:[#allocation15 + $0x90] sm:$0xff] }
 0x4de   : > { %2466 = vmatprep.mubr.msk.f32.mxu1 %vm2996_vm1, %v2994_v0  ;;  %2356 = vmatpush3.msra.mxu1 %v1901_v58  ;;  %v1888_v58 = vld [vmem:[#allocation12] sm:$0xff] }
 0x4df   : > { %2357 = vmatprep.subr.mxu1 %v1916_v59  ;;  %v2000_v59 = vld [vmem:[#allocation15 + $0x10] sm:$0xff] }
 0x4e0   : > { %2358 = vmatpush3.msra.mxu1 %v1900_v28  ;;  %v2015_v28 = vld [vmem:[#allocation15 + $0x88] sm:$0xff] }
 0x4e1   : > { %2467 = vmatmul.mubr.f32.gmra.mxu1 %v1646_v50  ;;  %2359 = vmatprep.subr.mxu1 %v1915_v60  ;;  %v1999_v60 = vld [vmem:[#allocation15 + $0x8] sm:$0xff] }
 0x4e2   : > { %2360 = vmatpush3.msra.mxu1 %v1899_v31  ;;  %v2014_v31 = vld [vmem:[#allocation15 + $0x80] sm:$0xff] }
 0x4e3   : > { %2361 = vmatprep.subr.mxu1 %v1914_v62  ;;  %v1998_v62 = vld [vmem:[#allocation15] sm:$0xff] }
 0x4e4   : > { %2362 = vmatpush3.msra.mxu1 %v1898_v3 }
 0x4e5   : > { %2363 = vmatprep.subr.mxu1 %v1913_v4 }
 0x4e6   : > { %2364 = vmatpush3.msra.mxu1 %v1897_v5 }
 0x4e7   : > { %2365 = vmatprep.subr.mxu1 %v1912_v6 }
 0x4e8   : > { %2366 = vmatpush3.msra.mxu1 %v1896_v57 }
 0x4e9   : > { %2367 = vmatprep.subr.mxu1 %v1911_v13 }
 0x4ea   : > { %2368 = vmatpush3.msra.mxu1 %v1895_v52 }
 0x4eb   : > { %2369 = vmatprep.subr.mxu1 %v1910_v14  ;;  %v2322_v14 = vld [vmem:[#allocation13] ss:$0 sm:$0xff] }
 0x4ec   : > { %2370 = vmatpush3.msra.mxu1 %v1894_v16 }
 0x4ed   : > { %2371 = vmatprep.subr.mxu1 %v1909_v51 }
 0x4ee   : > { %2372 = vmatpush3.msra.mxu1 %v1893_v2 }
 0x4ef   : > { %2373 = vmatprep.subr.mxu1 %v1908_v21 }
 0x4f0   : > { %2374 = vmatpush3.msra.mxu1 %v1892_v43 }
 0x4f1   : > { %2375 = vmatprep.subr.mxu1 %v1907_v53 }
 0x4f2   : > { %2376 = vmatpush3.msra.mxu1 %v1891_v20 }
 0x4f3   : > { %2377 = vmatprep.subr.mxu1 %v1906_v22 }
 0x4f4   : > { %2378 = vmatpush3.msra.mxu1 %v1890_v23 }
 0x4f5   : > { %2379 = vmatprep.subr.mxu1 %v1905_v19 }
 0x4f6   : > { %2380 = vmatpush3.msra.mxu1 %v1889_v8 }
 0x4f7   : > { %2381 = vmatprep.subr.mxu1 %v1904_v55 }
 0x4f8   : > { %2382 = vmatpush3.msra.mxu1 %v1888_v58 }
 0x58d   : > { %v3595_v17 = vpop.f32.mrf.mxu1 }
 0x58f   : > { %v2447_v1 = vpop.f32.mrf.mxu1 }
 0x591   : > { %v3597_v29 = vpop.f32.mrf.mxu1 }
 0x593   : > { %v2450_v12 = vpop.f32.mrf.mxu1 }
 0x595   : > { %v3599_v10 = vpop.f32.mrf.mxu1 }
 0x597   : > { %v2453_v11 = vpop.f32.mrf.mxu1 }
 0x599   : > { %v1752_v61 = vpop.f32.mrf.mxu1 }
 0x59a   : > { %v1766_v33 = vsel %vm1482_vm2, %v1752_v61, -inf }
 0x59b   : > { %1767 = vmax.xlane.f32.xlu0 %v1766_v33  ;;  %v2462_v34 = vpop.f32.mrf.mxu1  ;;  %v2028_v33 = vld [vmem:[#allocation15 + $0xf0] sm:$0xff] }
 0x59c   : > { %v2012_v34 = vld [vmem:[#allocation15 + $0x70] sm:$0xff] }
 0x59d   : > { %v1757_v32 = vpop.f32.mrf.mxu1 }
 0x59e   : > { %v1769_v35 = vsel %vm1482_vm2, %v1757_v32, -inf }
 0x59f   : > { %1770 = vmax.xlane.f32.xlu1 %v1769_v35  ;;  %v2465_v36 = vpop.f32.mrf.mxu1  ;;  %v2027_v35 = vld [vmem:[#allocation15 + $0xe8] sm:$0xff] }
 0x5a1   : > { %v1762_v37 = vpop.f32.mrf.mxu1 }
 0x5a2   : > { %v1772_v39 = vsel %vm1482_vm2, %v1762_v37, -inf }
 0x5a3   : > { %1773 = vmax.xlane.f32.xlu0 %v1772_v39  ;;  %v2468_v40 = vpop.f32.mrf.mxu1  ;;  %v2026_v39 = vld [vmem:[#allocation15 + $0xe0] sm:$0xff] }
 0x5a4   : > { %v2010_v40 = vld [vmem:[#allocation15 + $0x60] sm:$0xff] }
 0x624   : > { %v1768_v42 = vpop.xlane.xlu0 %1767 }
 0x625   : > { %v1775_v38 = vsub.f32 %v1752_v61, %v1768_v42  ;;  %v2013_v61 = vld [vmem:[#allocation15 + $0x78] sm:$0xff] }
 0x627   : > { %v1778_v7 = vmul.f32 1.442695, %v1775_v38  ;;  %v2025_v38 = vld [vmem:[#allocation15 + $0xd8] sm:$0xff] }
 0x628   : > { %v1771_v15 = vpop.xlane.xlu1 %1770 }
 0x629   : > { %2648 = vpow2.f32 %v1778_v7  ;;  %v1776_v26 = vsub.f32 %v1757_v32, %v1771_v15  ;;  %v2009_v15 = vld [vmem:[#allocation15 + $0x58] sm:$0xff] }
 0x62b   : > { %v1780_v30 = vmul.f32 1.442695, %v1776_v26  ;;  %v2024_v26 = vld [vmem:[#allocation15 + $0xd0] sm:$0xff] }
 0x62c   : > { %v1774_v44 = vpop.xlane.xlu0 %1773 }
 0x62d   : > { %2650 = vpow2.f32 %v1780_v30  ;;  %v1777_v46 = vsub.f32 %v1762_v37, %v1774_v44  ;;  %v2011_v37 = vld [vmem:[#allocation15 + $0x68] sm:$0xff]  ;;  %v2008_v30 = vld [vmem:[#allocation15 + $0x50] sm:$0xff] }
 0x62e   : > { %v2023_v44 = vld [vmem:[#allocation15 + $0xc8] sm:$0xff] }
 0x62f   : > { %v1782_v24 = vmul.f32 1.442695, %v1777_v46  ;;  %v2007_v46 = vld [vmem:[#allocation15 + $0x48] sm:$0xff] }
 0x631   : > { %2652 = vpow2.f32 %v1782_v24  ;;  %v2022_v24 = vld [vmem:[#allocation15 + $0xc0] sm:$0xff] }
 0x636   : > { %v3604_v45 = vpop.eup %2648 }
 0x637   : > { %v1784_v27 = vsel %vm1482_vm2, %v3604_v45, 0.0 }
 0x638   : > { %1785 = vadd.xlane.f32.xlu0 %v1784_v27  ;;  %v2005_v27 = vld [vmem:[#allocation15 + $0x38] sm:$0xff] }
 0x63a   : > { %v3608_v63 = vpop.eup %2650 }
 0x63b   : > { %v1787_v41 = vsel %vm1482_vm2, %v3608_v63, 0.0 }
 0x63c   : > { %1788 = vadd.xlane.f32.xlu0 %v1787_v41  ;;  %v2004_v41 = vld [vmem:[#allocation15 + $0x30] sm:$0xff] }
 0x63e   : > { %v3612_v48 = vpop.eup %2652 }
 0x63f   : > { %v1790_v18 = vsel %vm1482_vm2, %v3612_v48, 0.0 }
 0x640   : > { %1791 = vadd.xlane.f32.xlu1 %v1790_v18  ;;  %v2003_v18 = vld [vmem:[#allocation15 + $0x28] sm:$0xff] }
 0x6c1   : > { %v1786_v25 = vpop.xlane.xlu0 %1785 }
 0x6c2   : > { %2654 = vrcp.f32 %v1786_v25 }
 0x6c5   : > { %v1789_v50 = vpop.xlane.xlu0 %1788 }
 0x6c6   : > { %2656 = vrcp.f32 %v1789_v50 }
 0x6c9   : > { %v1792_v1 = vpop.xlane.xlu1 %1791 }
 0x6ca   : > { %2658 = vrcp.f32 %v1792_v1 }
 0x6cf   : > { %v2655_v12 = vpop.eup %2654 }
 0x6d0   : > { %v1794_v11 = vmul.f32 %v2655_v12, %v3604_v45  ;;  %v2021_v45 = vld [vmem:[#allocation15 + $0xb8] sm:$0xff] }
 0x6d2   : > { %2476 = vmatmul.mubr.msk.f32.vlgmr.msra.gmra.mxu0 %vm1482_vm2, %v1794_v11 }
 0x6d3   : > { %v2657_v32 = vpop.eup %2656  ;;  %2478 = vmatprep.mubr.msk.f32.mxu0 %vm2996_vm1, %v2994_v0  ;;  %2387 = vmatpush3.msra.mxu0 %v2013_v61 }
 0x6d4   : > { %v1796_v36 = vmul.f32 %v2657_v32, %v3608_v63  ;;  %2388 = vmatprep.subr.mxu0 %v2028_v33  ;;  %v2020_v63 = vld [vmem:[#allocation15 + $0xb0] sm:$0xff] }
 0x6d5   : > { %2389 = vmatpush3.msra.mxu0 %v2012_v34 }
 0x6d6   : > { %2479 = vmatmul.mubr.msk.f32.gmra.mxu0 %vm1482_vm2, %v1796_v36  ;;  %2390 = vmatprep.subr.mxu0 %v2027_v35 }
 0x6d7   : > { %v2659_v42 = vpop.eup %2658  ;;  %2481 = vmatprep.mubr.msk.f32.mxu0 %vm2996_vm1, %v2994_v0  ;;  %2391 = vmatpush3.msra.mxu0 %v2011_v37  ;;  %v2006_v0 = vld [vmem:[#allocation15 + $0x40] sm:$0xff] }
 0x6d8   : > { %v1798_v7 = vmul.f32 %v2659_v42, %v3612_v48  ;;  %2392 = vmatprep.subr.mxu0 %v2026_v39  ;;  %v2019_v48 = vld [vmem:[#allocation15 + $0xa8] sm:$0xff] }
 0x6d9   : > { %2393 = vmatpush3.msra.mxu0 %v2010_v40 }
 0x6da   : > { %2482 = vmatmul.mubr.msk.f32.gmra.mxu0 %vm1482_vm2, %v1798_v7  ;;  %2394 = vmatprep.subr.mxu0 %v2025_v38 }
 0x6db   : > { %2395 = vmatpush3.msra.mxu0 %v2009_v15 }
 0x6dc   : > { %2396 = vmatprep.subr.mxu0 %v2024_v26 }
 0x6dd   : > { %2397 = vmatpush3.msra.mxu0 %v2008_v30 }
 0x6de   : > { %2398 = vmatprep.subr.mxu0 %v2023_v44 }
 0x6df   : > { %2399 = vmatpush3.msra.mxu0 %v2007_v46 }
 0x6e0   : > { %2400 = vmatprep.subr.mxu0 %v2022_v24 }
 0x6e1   : > { %2401 = vmatpush3.msra.mxu0 %v2006_v0 }
 0x6e2   : > { %2402 = vmatprep.subr.mxu0 %v2021_v45 }
 0x6e3   : > { %2403 = vmatpush3.msra.mxu0 %v2005_v27 }
 0x6e4   : > { %2404 = vmatprep.subr.mxu0 %v2020_v63 }
 0x6e5   : > { %2405 = vmatpush3.msra.mxu0 %v2004_v41 }
 0x6e6   : > { %2406 = vmatprep.subr.mxu0 %v2019_v48 }
 0x6e7   : > { %2407 = vmatpush3.msra.mxu0 %v2003_v18 }
 0x6e8   : > { %2408 = vmatprep.subr.mxu0 %v2018_v49 }
 0x6e9   : > { %2409 = vmatpush3.msra.mxu0 %v2002_v54 }
 0x6ea   : > { %2410 = vmatprep.subr.mxu0 %v2017_v9 }
 0x6eb   : > { %2411 = vmatpush3.msra.mxu0 %v2001_v47 }
 0x6ec   : > { %2412 = vmatprep.subr.mxu0 %v2016_v56 }
 0x6ed   : > { %2413 = vmatpush3.msra.mxu0 %v2000_v59 }
 0x6ee   : > { %2414 = vmatprep.subr.mxu0 %v2015_v28 }
 0x6ef   : > { %2415 = vmatpush3.msra.mxu0 %v1999_v60 }
 0x6f0   : > { %2416 = vmatprep.subr.mxu0 %v2014_v31 }
 0x6f1   : > { %2417 = vmatpush3.msra.mxu0 %v1998_v62 }
 0x792   : > { %v1874_v3 = vpop.f32.mrf.mxu0 }
 0x793   : > { %1991 = vmatprep.mubr.f32.mxu1 %v1874_v3 }
 0x794   : > { %v2477_v4 = vpop.f32.mrf.mxu0  ;;  %1992 = vmatmul.mubr.f32.vlgmr.msra.gmra.mxu1 %v3595_v17 }
 0x796   : > { %v1879_v5 = vpop.f32.mrf.mxu0 }
 0x797   : > { %2101 = vmatprep.mubr.f32.mxu0 %v1879_v5 }
 0x798   : > { %v2480_v6 = vpop.f32.mrf.mxu0  ;;  %2102 = vmatmul.mubr.f32.vlgmr.msra.gmra.mxu0 %v3597_v29  ;;  %v2323_v29 = vld [vmem:[%s3659_s10] ss:$0 sm:$0xff] }
 0x79a   : > { %v1884_v57 = vpop.f32.mrf.mxu0 }
 0x79b   : > { %2106 = vmatprep.mubr.f32.mxu0 %v1884_v57 }
 0x79c   : > { %v2483_v13 = vpop.f32.mrf.mxu0  ;;  %2107 = vmatmul.mubr.f32.gmra.mxu0 %v3599_v10 }
 0x854   : > { %v2383_v52 = vpop.f32.mrf.mxu1 }
 0x856   : > { %v2384_v16 = vpop.f32.mrf.mxu1 }
 0x857   : > { %v2385_v51 = vadd.f32 %v2384_v16, %v2383_v52 }
 0x858   : > { %v2418_v17 = vpop.f32.mrf.mxu0 }
 0x859   : > { %v1994_v2 = vadd.f32 %v2385_v51, %v2322_v14 }
 0x85a   : > { %v2419_v21 = vpop.f32.mrf.mxu0 }
 0x85b   : > { %1997 = vst [vmem:[%s573_s14] sm:$0xff] %v1994_v2  ;;  %v2420_v43 = vadd.f32 %v2419_v21, %v2418_v17 }
 0x85c   : > { %v2421_v53 = vpop.f32.mrf.mxu0 }
 0x85d   : > { %v2104_v10 = vadd.f32 %v2420_v43, %v2323_v29 }
 0x85e   : > { %v2422_v20 = vpop.f32.mrf.mxu0 }
 0x85f   : > { %2112 = vst [vmem:[%s573_s14 + $0x8] sm:$0xff] %v2104_v10  ;;  %v2423_v22 = vadd.f32 %v2422_v20, %v2421_v53 }
 0x861   : > { %v2109_v23 = vadd.f32 %v2423_v22, %v2323_v29 }
 0x863   : > { %2113 = vst [vmem:[%s573_s14 + $0x10] sm:$0xff] %v2109_v23 }
 0x864 PF: > { %p27_p11 = scmp.ge.s32.totalorder %s3190_s29, 4   ;;  %s3691_s21 = smov %s2968_s22 }
 0x865   : > { %s3692_s22 = smov %s2972_s23  ;;  %s3693_s23 = smov %s3201_s18 }
 0x866   : > { %s3694_s24 = smov %s3190_s29  ;;  %29 = sbr.rel (!%p27_p11) target bundleno = 11 (0xb), region = 150 }
 0x86b   :  { %2135 = vsyncpa [#allocation3], 1 }
 0x86c   :  { %2137 = vsyncpa [#allocation3 + $0x1], 1 }
 0x86d   :  { %2138 = vsyncpa [#allocation5], 1 }
 0x86e   :  { %2139 = vsyncpa [#allocation8], 1 }
 0x86f   :  { %2140 = vsyncpa [#allocation11], 1 }
 0x870   :  { %2141 = vsyncpa [#allocation14], 1 }
 0x871   :  { %2142 = vsyncpa [#allocation17], 1 }

</bundles_post_ra>
